<compile_context>
chip_gen: v7x
topology: tpu7x:2x2x1
jax: 0.10.0
libtpu: 0.0.40
codegen_flags: <defaults>
</compile_context>

<pallas_src>
import jax
import jax.numpy as jnp
import numpy as np
from jax.experimental import pallas as pl
from jax.experimental.pallas import tpu as pltpu

HIDDEN_DIM = 128   # module's hidden_dim
OUTPUT_DIM = 1     # module's output_dim
NUM_LAYERS = 2     # module's num_layers
SEQ_LEN = 8
BATCH = 16


def _make_kernel(L, H, D):
    assert L == 2, "kernel is specialized for num_layers=2 (as in the module)"
    assert D == 1, "kernel is specialized for output_dim=1 (as in the module)"

    def kernel(x_ref, h_ref, c_ref, enc_ref, w4_ref, wh_ref,
               hout_ref, cout_ref, misc_ref):
        B, S, _ = enc_ref.shape            # static Python ints

        # ---- inputs (full batch, single grid step) ----
        x = x_ref[...]                     # (B, 1)
        h0_prev = h_ref[0]                 # (B, H)
        h1_prev = h_ref[1]                 # (B, H) == hidden[-1]
        c0_prev = c_ref[0]
        c1_prev = c_ref[1]
        enc = enc_ref[...]                 # (B, S, H)

        # ---- packed weight slabs (static, lane/sublane-aligned slices) ----
        w_l0 = w4_ref[0:2 * H, :]          # [Ww0^T ; Whh0^T]   (2H, 4H)
        w_l1 = w4_ref[2 * H:4 * H, :]      # [Wih1^T ; Whh1^T]  (2H, 4H)
        wx0 = w4_ref[4 * H + 0:4 * H + 1, :]   # x (D=1) -> gates, layer 0 (1, 4H)
        b0 = w4_ref[4 * H + 1:4 * H + 2, :]    # bih0 + bhh0               (1, 4H)
        b1 = w4_ref[4 * H + 2:4 * H + 3, :]    # bih1 + bhh1               (1, 4H)

        w_h = wh_ref[0:H, :]               # attn weight, hidden half      (H, H)
        w_e = wh_ref[H:2 * H, :]           # attn weight, encoder half     (H, H)
        v_row = wh_ref[2 * H + 0:2 * H + 1, :]       # attention vector    (1, H)
        attn_b = wh_ref[2 * H + 1:2 * H + 2, :]      # attn bias           (1, H)
        fc_row = wh_ref[2 * H + 2:2 * H + 3, :]      # fc weight (D=1)     (1, H)
        fc_b = wh_ref[2 * H + 3:2 * H + 4, 0:1]      # fc bias             (1, 1)

        # ---- cross attention (split projections, no 2H-feature concat) ----
        h_att = jnp.dot(h1_prev, w_h, preferred_element_type=jnp.float32) + attn_b
        e_att = jnp.dot(enc.reshape(B * S, H), w_e,
                        preferred_element_type=jnp.float32).reshape(B, S, H)
        energy = jnp.tanh(e_att + h_att[:, None, :])              # (B, S, H)
        # VPU multiply + lane reduce instead of an N=1 MXU matmul.
        scores = jnp.sum(energy * v_row[None, :, :], axis=-1)     # (B, S)

        m = jnp.max(scores, axis=-1, keepdims=True)
        es = jnp.exp(scores - m)
        aw = es / jnp.sum(es, axis=-1, keepdims=True)             # (B, S)
        weighted = jnp.sum(enc * aw[:, :, None], axis=1)          # (B, H)

        # ---- LSTM layer 0: fused K=2H matmul (lane-aligned concat is free) ----
        in0 = jnp.concatenate([weighted, h0_prev], axis=-1)       # (B, 2H)
        gates0 = (x * wx0                                         # (B,1)*(1,4H)
                  + jnp.dot(in0, w_l0, preferred_element_type=jnp.float32)
                  + b0)                                           # (B, 4H)
        i0 = jax.nn.sigmoid(gates0[:, 0:H])
        f0 = jax.nn.sigmoid(gates0[:, H:2 * H])
        g0 = jnp.tanh(gates0[:, 2 * H:3 * H])
        o0 = jax.nn.sigmoid(gates0[:, 3 * H:4 * H])
        c0 = f0 * c0_prev + i0 * g0
        h0 = o0 * jnp.tanh(c0)

        # ---- LSTM layer 1: fused K=2H matmul ----
        in1 = jnp.concatenate([h0, h1_prev], axis=-1)             # (B, 2H)
        gates1 = (jnp.dot(in1, w_l1, preferred_element_type=jnp.float32) + b1)
        i1 = jax.nn.sigmoid(gates1[:, 0:H])
        f1 = jax.nn.sigmoid(gates1[:, H:2 * H])
        g1 = jnp.tanh(gates1[:, 2 * H:3 * H])
        o1 = jax.nn.sigmoid(gates1[:, 3 * H:4 * H])
        c1 = f1 * c1_prev + i1 * g1
        h1 = o1 * jnp.tanh(c1)

        # ---- output projection (D == 1 -> VPU reduce, keeps MXU free) ----
        pred = jnp.sum(h1 * fc_row, axis=-1, keepdims=True) + fc_b   # (B, 1)

        # ---- lane-dense writes ----
        hout_ref[0] = h0
        hout_ref[1] = h1
        cout_ref[0] = c0
        cout_ref[1] = c1
        # pack pred (B,1) + attention weights (B,S) into one 128-lane block
        misc_ref[...] = jnp.concatenate(
            [pred, aw, jnp.zeros((B, 128 - 1 - S), jnp.float32)], axis=-1)

    return kernel


def pack_params(p, H, D):
    """One-time packing of the module parameters into two lane-aligned slabs.

    Done once (outside the decode loop) so no per-call transpose/reshape ops.
    Scalar rows are compacted into a single 8-row group per slab.
    """
    wih0 = p["wih0"]                                        # (4H, D + H)

    extra4 = jnp.concatenate([
        wih0[:, :D].T,                                      # Wx0^T    row 4H+0
        (p["bih0"] + p["bhh0"]).reshape(1, 4 * H),          # b0       row 4H+1
        (p["bih1"] + p["bhh1"]).reshape(1, 4 * H),          # b1       row 4H+2
        jnp.zeros((5, 4 * H), jnp.float32),                 # sublane pad to 8
    ], axis=0)
    w4 = jnp.concatenate([
        wih0[:, D:].T,                                      # Ww0^T   rows [0, H)
        p["whh0"].T,                                        # Whh0^T  rows [H, 2H)
        p["wih1"].T,                                        # Wih1^T  rows [2H, 3H)
        p["whh1"].T,                                        # Whh1^T  rows [3H, 4H)
        extra4,
    ], axis=0).astype(jnp.float32)                          # (4H + 8, 4H)

    fcb_row = jnp.pad(p["fc_b"].reshape(1, D), ((0, 0), (0, H - D)))
    extraH = jnp.concatenate([
        p["v_W"],                                           # v       row 2H+0
        p["attn_b"].reshape(1, H),                          # attn_b  row 2H+1
        p["fc_W"],                                          # fc_W    row 2H+2
        fcb_row,                                            # fc_b    row 2H+3
        jnp.zeros((4, H), jnp.float32),                     # sublane pad to 8
    ], axis=0)
    wh = jnp.concatenate([
        p["attn_W"][:, :H].T,                               # W_h^T   rows [0, H)
        p["attn_W"][:, H:].T,                               # W_enc^T rows [H, 2H)
        extraH,
    ], axis=0).astype(jnp.float32)                          # (2H + 8, H)
    return w4, wh


@jax.jit
def decoder_forward(x, hidden, cell, encoder_outputs, w4, wh):
    """Pallas implementation of DecoderWithCrossAttention.forward (single step)."""
    B, S, H = encoder_outputs.shape
    L = hidden.shape[0]
    D = x.shape[2]
    assert B % 8 == 0, "pad batch to a multiple of 8 in the caller"
    assert S % 8 == 0, "free (B,S,H)->(B*S,H) reshape requires S % 8 == 0"

    kernel = _make_kernel(L, H, D)

    # Single grid step: whole batch at once (weight-DMA bound workload; avoids
    # per-grid-step overhead and weight duplication across TensorCores).
    hout, cout, misc = pl.pallas_call(
        kernel,
        grid=(1,),
        in_specs=[
            pl.BlockSpec((B, D), lambda b: (0, 0)),              # x (B, D)
            pl.BlockSpec((L, B, H), lambda b: (0, 0, 0)),        # hidden (L, B, H)
            pl.BlockSpec((L, B, H), lambda b: (0, 0, 0)),        # cell   (L, B, H)
            pl.BlockSpec((B, S, H), lambda b: (0, 0, 0)),        # encoder_outputs
            pl.BlockSpec((4 * H + 8, 4 * H), lambda b: (0, 0)),  # packed 4H-wide slab
            pl.BlockSpec((2 * H + 8, H), lambda b: (0, 0)),      # packed H-wide slab
        ],
        out_specs=[
            pl.BlockSpec((L, B, H), lambda b: (0, 0, 0)),        # hidden out (native)
            pl.BlockSpec((L, B, H), lambda b: (0, 0, 0)),        # cell out   (native)
            pl.BlockSpec((B, 128), lambda b: (0, 0)),            # [pred | attn | pad]
        ],
        out_shape=(
            jax.ShapeDtypeStruct((L, B, H), jnp.float32),
            jax.ShapeDtypeStruct((L, B, H), jnp.float32),
            jax.ShapeDtypeStruct((B, 128), jnp.float32),
        ),
        compiler_params=pltpu.CompilerParams(
            dimension_semantics=("arbitrary",)),
    )(x.reshape(B, D), hidden, cell, encoder_outputs, w4, wh)

    pred = misc[:, 0:D]                   # (B, 1)
    aw = misc[:, D:D + S]                 # (B, S)
    return pred[:, None, :], hout, cout, aw


def decoder_forward_reference(x, hidden, cell, enc, p):
    """Pure-JAX mirror of the PyTorch forward (for validation)."""
    B, S, H = enc.shape
    L = hidden.shape[0]
    h_last = hidden[-1]                                    # (B, H)
    h_rep = jnp.broadcast_to(h_last[:, None, :], (B, S, H))
    cat = jnp.concatenate([h_rep, enc], axis=2)
    energy = jnp.tanh(cat @ p["attn_W"].T + p["attn_b"])
    scores = jnp.squeeze(energy @ p["v_W"].T, -1)          # (B, S)
    aw = jax.nn.softmax(scores, axis=1)
    weighted = jnp.einsum("bs,bsh->bh", aw, enc)
    cur = jnp.concatenate([x[:, 0, :], weighted], axis=1)

    h_list, c_list = [], []
    for l in range(L):
        gates = (cur @ p[f"wih{l}"].T + p[f"bih{l}"]
                 + hidden[l] @ p[f"whh{l}"].T + p[f"bhh{l}"])
        i, f, g, o = jnp.split(gates, 4, axis=1)
        i, f, g, o = jax.nn.sigmoid(i), jax.nn.sigmoid(f), jnp.tanh(g), jax.nn.sigmoid(o)
        c_new = f * cell[l] + i * g
        h_new = o * jnp.tanh(c_new)
        h_list.append(h_new)
        c_list.append(c_new)
        cur = h_new
    pred = cur @ p["fc_W"].T + p["fc_b"]
    return pred[:, None, :], jnp.stack(h_list), jnp.stack(c_list), aw


def init_params(key, H, D, L):
    ks = jax.random.split(key, 13)
    s = 0.1
    return {
        "attn_W": s * jax.random.normal(ks[0], (H, 2 * H), jnp.float32),
        "attn_b": s * jax.random.normal(ks[1], (H,), jnp.float32),
        "v_W":    s * jax.random.normal(ks[2], (1, H), jnp.float32),
        "wih0":   s * jax.random.normal(ks[3], (4 * H, D + H), jnp.float32),
        "whh0":   s * jax.random.normal(ks[4], (4 * H, H), jnp.float32),
        "bih0":   s * jax.random.normal(ks[5], (4 * H,), jnp.float32),
        "bhh0":   s * jax.random.normal(ks[6], (4 * H,), jnp.float32),
        "wih1":   s * jax.random.normal(ks[7], (4 * H, H), jnp.float32),
        "whh1":   s * jax.random.normal(ks[8], (4 * H, H), jnp.float32),
        "bih1":   s * jax.random.normal(ks[9], (4 * H,), jnp.float32),
        "bhh1":   s * jax.random.normal(ks[10], (4 * H,), jnp.float32),
        "fc_W":   s * jax.random.normal(ks[11], (D, H), jnp.float32),
        "fc_b":   s * jax.random.normal(ks[12], (D,), jnp.float32),
    }


if __name__ == "__main__":
    B, S, H, D, L = BATCH, SEQ_LEN, HIDDEN_DIM, OUTPUT_DIM, NUM_LAYERS
    key = jax.random.PRNGKey(0)
    k_x, k_h, k_c, k_e, k_p = jax.random.split(key, 5)

    x = jax.random.normal(k_x, (B, 1, D), jnp.float32)
    hidden = jax.random.normal(k_h, (L, B, H), jnp.float32)
    cell = jax.random.normal(k_c, (L, B, H), jnp.float32)
    enc = jax.random.normal(k_e, (B, S, H), jnp.float32)
    params = init_params(k_p, H, D, L)

    # One-time weight packing (hoisted out of the per-step decode path).
    w4, wh = pack_params(params, H, D)

    pred, h_new, c_new, aw = jax.block_until_ready(
        decoder_forward(x, hidden, cell, enc, w4, wh))

    pred_r, h_r, c_r, aw_r = decoder_forward_reference(x, hidden, cell, enc, params)

    np.testing.assert_allclose(np.asarray(pred), np.asarray(pred_r), rtol=1e-5, atol=1e-5)
    np.testing.assert_allclose(np.asarray(h_new), np.asarray(h_r), rtol=1e-5, atol=1e-5)
    np.testing.assert_allclose(np.asarray(c_new), np.asarray(c_r), rtol=1e-5, atol=1e-5)
    np.testing.assert_allclose(np.asarray(aw), np.asarray(aw_r), rtol=1e-5, atol=1e-5)

    print("KERNEL_OK")
</pallas_src>

<mosaic_0001>
module attributes {stable_mosaic.version = 11 : i64} {
  func.func @kernel(%arg0: i32, %arg1: memref<16x1xf32, #tpu.memory_space<vmem>>, %arg2: memref<2x16x128xf32, #tpu.memory_space<vmem>>, %arg3: memref<2x16x128xf32, #tpu.memory_space<vmem>>, %arg4: memref<16x8x128xf32, #tpu.memory_space<vmem>>, %arg5: memref<520x512xf32, #tpu.memory_space<vmem>>, %arg6: memref<264x128xf32, #tpu.memory_space<vmem>>, %arg7: memref<2x16x128xf32, #tpu.memory_space<vmem>>, %arg8: memref<2x16x128xf32, #tpu.memory_space<vmem>>, %arg9: memref<16x128xf32, #tpu.memory_space<vmem>>) attributes {dimension_semantics = [#tpu.dimension_semantics<arbitrary>], iteration_bounds = array<i64: 1>, scalar_prefetch = 0 : i64, scratch_operands = 0 : i64, tpu.core_type = #tpu.core_type<tc>, window_params = [{pipeline_mode = #tpu.pipeline_mode<synchronous>, transform_indices = @transform_0, window_bounds = array<i64: 16, 1>}, {pipeline_mode = #tpu.pipeline_mode<synchronous>, transform_indices = @transform_1, window_bounds = array<i64: 2, 16, 128>}, {pipeline_mode = #tpu.pipeline_mode<synchronous>, transform_indices = @transform_2, window_bounds = array<i64: 2, 16, 128>}, {pipeline_mode = #tpu.pipeline_mode<synchronous>, transform_indices = @transform_3, window_bounds = array<i64: 16, 8, 128>}, {pipeline_mode = #tpu.pipeline_mode<synchronous>, transform_indices = @transform_4, window_bounds = array<i64: 520, 512>}, {pipeline_mode = #tpu.pipeline_mode<synchronous>, transform_indices = @transform_5, window_bounds = array<i64: 264, 128>}, {pipeline_mode = #tpu.pipeline_mode<synchronous>, transform_indices = @transform_6, window_bounds = array<i64: 2, 16, 128>}, {pipeline_mode = #tpu.pipeline_mode<synchronous>, transform_indices = @transform_7, window_bounds = array<i64: 2, 16, 128>}, {pipeline_mode = #tpu.pipeline_mode<synchronous>, transform_indices = @transform_8, window_bounds = array<i64: 16, 128>}]} {
    %c0 = arith.constant 0 : index
    %c0_0 = arith.constant 0 : index
    %0 = vector.load %arg1[%c0, %c0_0] : memref<16x1xf32, #tpu.memory_space<vmem>>, vector<16x1xf32>
    %c0_1 = arith.constant 0 : index
    %c0_2 = arith.constant 0 : index
    %c0_3 = arith.constant 0 : index
    %1 = vector.load %arg2[%c0_1, %c0_2, %c0_3] : memref<2x16x128xf32, #tpu.memory_space<vmem>>, vector<1x16x128xf32>
    %2 = vector.shape_cast %1 : vector<1x16x128xf32> to vector<16x128xf32>
    %c1 = arith.constant 1 : index
    %c0_4 = arith.constant 0 : index
    %c0_5 = arith.constant 0 : index
    %3 = vector.load %arg2[%c1, %c0_4, %c0_5] : memref<2x16x128xf32, #tpu.memory_space<vmem>>, vector<1x16x128xf32>
    %4 = vector.shape_cast %3 : vector<1x16x128xf32> to vector<16x128xf32>
    %c0_6 = arith.constant 0 : index
    %c0_7 = arith.constant 0 : index
    %c0_8 = arith.constant 0 : index
    %5 = vector.load %arg3[%c0_6, %c0_7, %c0_8] : memref<2x16x128xf32, #tpu.memory_space<vmem>>, vector<1x16x128xf32>
    %6 = vector.shape_cast %5 : vector<1x16x128xf32> to vector<16x128xf32>
    %c1_9 = arith.constant 1 : index
    %c0_10 = arith.constant 0 : index
    %c0_11 = arith.constant 0 : index
    %7 = vector.load %arg3[%c1_9, %c0_10, %c0_11] : memref<2x16x128xf32, #tpu.memory_space<vmem>>, vector<1x16x128xf32>
    %8 = vector.shape_cast %7 : vector<1x16x128xf32> to vector<16x128xf32>
    %c0_12 = arith.constant 0 : index
    %c0_13 = arith.constant 0 : index
    %c0_14 = arith.constant 0 : index
    %9 = vector.load %arg4[%c0_12, %c0_13, %c0_14] : memref<16x8x128xf32, #tpu.memory_space<vmem>>, vector<16x8x128xf32>
    %c0_15 = arith.constant 0 : index
    %c0_16 = arith.constant 0 : index
    %10 = vector.load %arg5[%c0_15, %c0_16] : memref<520x512xf32, #tpu.memory_space<vmem>>, vector<256x512xf32>
    %c256 = arith.constant 256 : index
    %c0_17 = arith.constant 0 : index
    %11 = vector.load %arg5[%c256, %c0_17] : memref<520x512xf32, #tpu.memory_space<vmem>>, vector<256x512xf32>
    %c512 = arith.constant 512 : index
    %c0_18 = arith.constant 0 : index
    %12 = vector.load %arg5[%c512, %c0_18] : memref<520x512xf32, #tpu.memory_space<vmem>>, vector<1x512xf32>
    %c513 = arith.constant 513 : index
    %c0_19 = arith.constant 0 : index
    %13 = vector.load %arg5[%c513, %c0_19] : memref<520x512xf32, #tpu.memory_space<vmem>>, vector<1x512xf32>
    %c514 = arith.constant 514 : index
    %c0_20 = arith.constant 0 : index
    %14 = vector.load %arg5[%c514, %c0_20] : memref<520x512xf32, #tpu.memory_space<vmem>>, vector<1x512xf32>
    %c0_21 = arith.constant 0 : index
    %c0_22 = arith.constant 0 : index
    %15 = vector.load %arg6[%c0_21, %c0_22] : memref<264x128xf32, #tpu.memory_space<vmem>>, vector<128x128xf32>
    %c128 = arith.constant 128 : index
    %c0_23 = arith.constant 0 : index
    %16 = vector.load %arg6[%c128, %c0_23] : memref<264x128xf32, #tpu.memory_space<vmem>>, vector<128x128xf32>
    %c256_24 = arith.constant 256 : index
    %c0_25 = arith.constant 0 : index
    %17 = vector.load %arg6[%c256_24, %c0_25] : memref<264x128xf32, #tpu.memory_space<vmem>>, vector<1x128xf32>
    %c257 = arith.constant 257 : index
    %c0_26 = arith.constant 0 : index
    %18 = vector.load %arg6[%c257, %c0_26] : memref<264x128xf32, #tpu.memory_space<vmem>>, vector<1x128xf32>
    %c258 = arith.constant 258 : index
    %c0_27 = arith.constant 0 : index
    %19 = vector.load %arg6[%c258, %c0_27] : memref<264x128xf32, #tpu.memory_space<vmem>>, vector<1x128xf32>
    %c259 = arith.constant 259 : index
    %c0_28 = arith.constant 0 : index
    %20 = vector.load %arg6[%c259, %c0_28] : memref<264x128xf32, #tpu.memory_space<vmem>>, vector<1x1xf32>
    %cst = arith.constant dense<0.000000e+00> : vector<16x128xf32>
    %21 = tpu.matmul %4, %15, %cst {dimension_numbers = #tpu.dot_dimension_numbers<[1], [0], [0], [1], [0, 0, 1, 1], [], []>} : vector<16x128xf32>, vector<128x128xf32>, vector<16x128xf32> -> vector<16x128xf32>
    %22 = vector.broadcast %18 : vector<1x128xf32> to vector<16x128xf32>
    %23 = arith.addf %21, %22 : vector<16x128xf32>
    %24 = vector.shape_cast %9 : vector<16x8x128xf32> to vector<128x128xf32>
    %cst_29 = arith.constant dense<0.000000e+00> : vector<128x128xf32>
    %25 = tpu.matmul %24, %16, %cst_29 {dimension_numbers = #tpu.dot_dimension_numbers<[1], [0], [0], [1], [0, 0, 1, 1], [], []>} : vector<128x128xf32>, vector<128x128xf32>, vector<128x128xf32> -> vector<128x128xf32>
    %26 = vector.shape_cast %25 : vector<128x128xf32> to vector<16x8x128xf32>
    %27 = vector.shape_cast %23 : vector<16x128xf32> to vector<16x1x128xf32>
    %28 = vector.broadcast %27 : vector<16x1x128xf32> to vector<16x8x128xf32>
    %29 = arith.addf %26, %28 : vector<16x8x128xf32>
    %30 = math.tanh %29 : vector<16x8x128xf32>
    %31 = vector.shape_cast %17 : vector<1x128xf32> to vector<1x1x128xf32>
    %32 = vector.broadcast %31 : vector<1x1x128xf32> to vector<16x8x128xf32>
    %33 = arith.mulf %30, %32 : vector<16x8x128xf32>
    %cst_30 = arith.constant dense<0.000000e+00> : vector<16x8xf32>
    %34 = vector.multi_reduction <add>, %33, %cst_30 [2] : vector<16x8x128xf32> to vector<16x8xf32>
    %cst_31 = arith.constant dense<0xFF800000> : vector<16xf32>
    %35 = vector.multi_reduction <maximumf>, %34, %cst_31 [1] : vector<16x8xf32> to vector<16xf32>
    %36 = vector.shape_cast %35 : vector<16xf32> to vector<16x1xf32>
    %37 = vector.broadcast %36 : vector<16x1xf32> to vector<16x8xf32>
    %38 = arith.subf %34, %37 : vector<16x8xf32>
    %39 = math.exp %38 : vector<16x8xf32>
    %cst_32 = arith.constant dense<0.000000e+00> : vector<16xf32>
    %40 = vector.multi_reduction <add>, %39, %cst_32 [1] : vector<16x8xf32> to vector<16xf32>
    %41 = vector.shape_cast %40 : vector<16xf32> to vector<16x1xf32>
    %42 = vector.broadcast %41 : vector<16x1xf32> to vector<16x8xf32>
    %43 = arith.divf %39, %42 : vector<16x8xf32>
    %44 = vector.shape_cast %43 : vector<16x8xf32> to vector<16x8x1xf32>
    %45 = vector.broadcast %44 : vector<16x8x1xf32> to vector<16x8x128xf32>
    %46 = arith.mulf %9, %45 : vector<16x8x128xf32>
    %cst_33 = arith.constant dense<0.000000e+00> : vector<16x128xf32>
    %47 = vector.multi_reduction <add>, %46, %cst_33 [1] : vector<16x8x128xf32> to vector<16x128xf32>
    %48 = tpu.concatenate %47, %2 in 1 : vector<16x128xf32>, vector<16x128xf32> -> vector<16x256xf32>
    %49 = vector.broadcast %0 : vector<16x1xf32> to vector<16x512xf32>
    %50 = vector.broadcast %12 : vector<1x512xf32> to vector<16x512xf32>
    %51 = arith.mulf %49, %50 : vector<16x512xf32>
    %cst_34 = arith.constant dense<0.000000e+00> : vector<16x512xf32>
    %52 = tpu.matmul %48, %10, %cst_34 {dimension_numbers = #tpu.dot_dimension_numbers<[1], [0], [0], [1], [0, 0, 1, 1], [], []>} : vector<16x256xf32>, vector<256x512xf32>, vector<16x512xf32> -> vector<16x512xf32>
    %53 = arith.addf %51, %52 : vector<16x512xf32>
    %54 = vector.broadcast %13 : vector<1x512xf32> to vector<16x512xf32>
    %55 = arith.addf %53, %54 : vector<16x512xf32>
    %56 = vector.extract_strided_slice %55 {offsets = [0, 0], sizes = [16, 128], strides = [1, 1]} : vector<16x512xf32> to vector<16x128xf32>
    %57 = arith.negf %56 : vector<16x128xf32>
    %58 = math.exp %57 : vector<16x128xf32>
    %cst_35 = arith.constant 1.000000e+00 : f32
    %59 = vector.broadcast %cst_35 : f32 to vector<16x128xf32>
    %60 = arith.addf %59, %58 : vector<16x128xf32>
    %61 = arith.divf %59, %60 : vector<16x128xf32>
    %62 = vector.extract_strided_slice %55 {offsets = [0, 128], sizes = [16, 128], strides = [1, 1]} : vector<16x512xf32> to vector<16x128xf32>
    %63 = arith.negf %62 : vector<16x128xf32>
    %64 = math.exp %63 : vector<16x128xf32>
    %cst_36 = arith.constant 1.000000e+00 : f32
    %65 = vector.broadcast %cst_36 : f32 to vector<16x128xf32>
    %66 = arith.addf %65, %64 : vector<16x128xf32>
    %67 = arith.divf %65, %66 : vector<16x128xf32>
    %68 = vector.extract_strided_slice %55 {offsets = [0, 256], sizes = [16, 128], strides = [1, 1]} : vector<16x512xf32> to vector<16x128xf32>
    %69 = math.tanh %68 : vector<16x128xf32>
    %70 = vector.extract_strided_slice %55 {offsets = [0, 384], sizes = [16, 128], strides = [1, 1]} : vector<16x512xf32> to vector<16x128xf32>
    %71 = arith.negf %70 : vector<16x128xf32>
    %72 = math.exp %71 : vector<16x128xf32>
    %cst_37 = arith.constant 1.000000e+00 : f32
    %73 = vector.broadcast %cst_37 : f32 to vector<16x128xf32>
    %74 = arith.addf %73, %72 : vector<16x128xf32>
    %75 = arith.divf %73, %74 : vector<16x128xf32>
    %76 = arith.mulf %67, %6 : vector<16x128xf32>
    %77 = arith.mulf %61, %69 : vector<16x128xf32>
    %78 = arith.addf %76, %77 : vector<16x128xf32>
    %79 = math.tanh %78 : vector<16x128xf32>
    %80 = arith.mulf %75, %79 : vector<16x128xf32>
    %81 = tpu.concatenate %80, %4 in 1 : vector<16x128xf32>, vector<16x128xf32> -> vector<16x256xf32>
    %cst_38 = arith.constant dense<0.000000e+00> : vector<16x512xf32>
    %82 = tpu.matmul %81, %11, %cst_38 {dimension_numbers = #tpu.dot_dimension_numbers<[1], [0], [0], [1], [0, 0, 1, 1], [], []>} : vector<16x256xf32>, vector<256x512xf32>, vector<16x512xf32> -> vector<16x512xf32>
    %83 = vector.broadcast %14 : vector<1x512xf32> to vector<16x512xf32>
    %84 = arith.addf %82, %83 : vector<16x512xf32>
    %85 = vector.extract_strided_slice %84 {offsets = [0, 0], sizes = [16, 128], strides = [1, 1]} : vector<16x512xf32> to vector<16x128xf32>
    %86 = arith.negf %85 : vector<16x128xf32>
    %87 = math.exp %86 : vector<16x128xf32>
    %cst_39 = arith.constant 1.000000e+00 : f32
    %88 = vector.broadcast %cst_39 : f32 to vector<16x128xf32>
    %89 = arith.addf %88, %87 : vector<16x128xf32>
    %90 = arith.divf %88, %89 : vector<16x128xf32>
    %91 = vector.extract_strided_slice %84 {offsets = [0, 128], sizes = [16, 128], strides = [1, 1]} : vector<16x512xf32> to vector<16x128xf32>
    %92 = arith.negf %91 : vector<16x128xf32>
    %93 = math.exp %92 : vector<16x128xf32>
    %cst_40 = arith.constant 1.000000e+00 : f32
    %94 = vector.broadcast %cst_40 : f32 to vector<16x128xf32>
    %95 = arith.addf %94, %93 : vector<16x128xf32>
    %96 = arith.divf %94, %95 : vector<16x128xf32>
    %97 = vector.extract_strided_slice %84 {offsets = [0, 256], sizes = [16, 128], strides = [1, 1]} : vector<16x512xf32> to vector<16x128xf32>
    %98 = math.tanh %97 : vector<16x128xf32>
    %99 = vector.extract_strided_slice %84 {offsets = [0, 384], sizes = [16, 128], strides = [1, 1]} : vector<16x512xf32> to vector<16x128xf32>
    %100 = arith.negf %99 : vector<16x128xf32>
    %101 = math.exp %100 : vector<16x128xf32>
    %cst_41 = arith.constant 1.000000e+00 : f32
    %102 = vector.broadcast %cst_41 : f32 to vector<16x128xf32>
    %103 = arith.addf %102, %101 : vector<16x128xf32>
    %104 = arith.divf %102, %103 : vector<16x128xf32>
    %105 = arith.mulf %96, %8 : vector<16x128xf32>
    %106 = arith.mulf %90, %98 : vector<16x128xf32>
    %107 = arith.addf %105, %106 : vector<16x128xf32>
    %108 = math.tanh %107 : vector<16x128xf32>
    %109 = arith.mulf %104, %108 : vector<16x128xf32>
    %110 = vector.broadcast %19 : vector<1x128xf32> to vector<16x128xf32>
    %111 = arith.mulf %109, %110 : vector<16x128xf32>
    %cst_42 = arith.constant dense<0.000000e+00> : vector<16xf32>
    %112 = vector.multi_reduction <add>, %111, %cst_42 [1] : vector<16x128xf32> to vector<16xf32>
    %113 = vector.shape_cast %112 : vector<16xf32> to vector<16x1xf32>
    %114 = vector.broadcast %20 : vector<1x1xf32> to vector<16x1xf32>
    %115 = arith.addf %113, %114 : vector<16x1xf32>
    %c0_43 = arith.constant 0 : index
    %c0_44 = arith.constant 0 : index
    %c0_45 = arith.constant 0 : index
    %116 = vector.load %arg7[%c0_43, %c0_44, %c0_45] : memref<2x16x128xf32, #tpu.memory_space<vmem>>, vector<1x16x128xf32>
    %117 = vector.shape_cast %116 : vector<1x16x128xf32> to vector<16x128xf32>
    %118 = vector.shape_cast %80 : vector<16x128xf32> to vector<1x16x128xf32>
    tpu.vector_store %arg7[%c0_43, %c0_44, %c0_45], %118 {strides = array<i32>} : memref<2x16x128xf32, #tpu.memory_space<vmem>>, vector<1x16x128xf32>,
    %c1_46 = arith.constant 1 : index
    %c0_47 = arith.constant 0 : index
    %c0_48 = arith.constant 0 : index
    %119 = vector.load %arg7[%c1_46, %c0_47, %c0_48] : memref<2x16x128xf32, #tpu.memory_space<vmem>>, vector<1x16x128xf32>
    %120 = vector.shape_cast %119 : vector<1x16x128xf32> to vector<16x128xf32>
    %121 = vector.shape_cast %109 : vector<16x128xf32> to vector<1x16x128xf32>
    tpu.vector_store %arg7[%c1_46, %c0_47, %c0_48], %121 {strides = array<i32>} : memref<2x16x128xf32, #tpu.memory_space<vmem>>, vector<1x16x128xf32>,
    %c0_49 = arith.constant 0 : index
    %c0_50 = arith.constant 0 : index
    %c0_51 = arith.constant 0 : index
    %122 = vector.load %arg8[%c0_49, %c0_50, %c0_51] : memref<2x16x128xf32, #tpu.memory_space<vmem>>, vector<1x16x128xf32>
    %123 = vector.shape_cast %122 : vector<1x16x128xf32> to vector<16x128xf32>
    %124 = vector.shape_cast %78 : vector<16x128xf32> to vector<1x16x128xf32>
    tpu.vector_store %arg8[%c0_49, %c0_50, %c0_51], %124 {strides = array<i32>} : memref<2x16x128xf32, #tpu.memory_space<vmem>>, vector<1x16x128xf32>,
    %c1_52 = arith.constant 1 : index
    %c0_53 = arith.constant 0 : index
    %c0_54 = arith.constant 0 : index
    %125 = vector.load %arg8[%c1_52, %c0_53, %c0_54] : memref<2x16x128xf32, #tpu.memory_space<vmem>>, vector<1x16x128xf32>
    %126 = vector.shape_cast %125 : vector<1x16x128xf32> to vector<16x128xf32>
    %127 = vector.shape_cast %107 : vector<16x128xf32> to vector<1x16x128xf32>
    tpu.vector_store %arg8[%c1_52, %c0_53, %c0_54], %127 {strides = array<i32>} : memref<2x16x128xf32, #tpu.memory_space<vmem>>, vector<1x16x128xf32>,
    %cst_55 = arith.constant 0.000000e+00 : f32
    %128 = vector.broadcast %cst_55 : f32 to vector<16x119xf32>
    %129 = tpu.concatenate %115, %43, %128 in 1 : vector<16x1xf32>, vector<16x8xf32>, vector<16x119xf32> -> vector<16x128xf32>
    %c0_56 = arith.constant 0 : index
    %c0_57 = arith.constant 0 : index
    %130 = vector.load %arg9[%c0_56, %c0_57] : memref<16x128xf32, #tpu.memory_space<vmem>>, vector<16x128xf32>
    tpu.vector_store %arg9[%c0_56, %c0_57], %129 {strides = array<i32>} : memref<16x128xf32, #tpu.memory_space<vmem>>, vector<16x128xf32>,
    return
  }
  func.func @transform_0(%arg0: i32) -> (i32, i32) {
    %c0_i32 = arith.constant 0 : i32
    %c0_i32_0 = arith.constant 0 : i32
    %c0_i32_1 = arith.constant 0 : i32
    return %c0_i32, %c0_i32_0 : i32, i32
  }
  func.func @transform_1(%arg0: i32) -> (i32, i32, i32) {
    %c0_i32 = arith.constant 0 : i32
    %c0_i32_0 = arith.constant 0 : i32
    %c0_i32_1 = arith.constant 0 : i32
    %c0_i32_2 = arith.constant 0 : i32
    return %c0_i32, %c0_i32_0, %c0_i32_1 : i32, i32, i32
  }
  func.func @transform_2(%arg0: i32) -> (i32, i32, i32) {
    %c0_i32 = arith.constant 0 : i32
    %c0_i32_0 = arith.constant 0 : i32
    %c0_i32_1 = arith.constant 0 : i32
    %c0_i32_2 = arith.constant 0 : i32
    return %c0_i32, %c0_i32_0, %c0_i32_1 : i32, i32, i32
  }
  func.func @transform_3(%arg0: i32) -> (i32, i32, i32) {
    %c0_i32 = arith.constant 0 : i32
    %c0_i32_0 = arith.constant 0 : i32
    %c0_i32_1 = arith.constant 0 : i32
    %c0_i32_2 = arith.constant 0 : i32
    return %c0_i32, %c0_i32_0, %c0_i32_1 : i32, i32, i32
  }
  func.func @transform_4(%arg0: i32) -> (i32, i32) {
    %c0_i32 = arith.constant 0 : i32
    %c0_i32_0 = arith.constant 0 : i32
    %c0_i32_1 = arith.constant 0 : i32
    return %c0_i32, %c0_i32_0 : i32, i32
  }
  func.func @transform_5(%arg0: i32) -> (i32, i32) {
    %c0_i32 = arith.constant 0 : i32
    %c0_i32_0 = arith.constant 0 : i32
    %c0_i32_1 = arith.constant 0 : i32
    return %c0_i32, %c0_i32_0 : i32, i32
  }
  func.func @transform_6(%arg0: i32) -> (i32, i32, i32) {
    %c0_i32 = arith.constant 0 : i32
    %c0_i32_0 = arith.constant 0 : i32
    %c0_i32_1 = arith.constant 0 : i32
    %c0_i32_2 = arith.constant 0 : i32
    return %c0_i32, %c0_i32_0, %c0_i32_1 : i32, i32, i32
  }
  func.func @transform_7(%arg0: i32) -> (i32, i32, i32) {
    %c0_i32 = arith.constant 0 : i32
    %c0_i32_0 = arith.constant 0 : i32
    %c0_i32_1 = arith.constant 0 : i32
    %c0_i32_2 = arith.constant 0 : i32
    return %c0_i32, %c0_i32_0, %c0_i32_1 : i32, i32, i32
  }
  func.func @transform_8(%arg0: i32) -> (i32, i32) {
    %c0_i32 = arith.constant 0 : i32
    %c0_i32_0 = arith.constant 0 : i32
    %c0_i32_1 = arith.constant 0 : i32
    return %c0_i32, %c0_i32_0 : i32, i32
  }
}

</mosaic_0001>

<bundles_post_ra>
// kernel: decoder_forward.1
= control target key start
LH: loop header
LB: loop body
LE: loop exit
PB: predicated region body
PF: predicated region fallthrough
CT: control target
= control target key end

     0   :  { %14 = vsyncpa [#allocation3], 0  ;;  %s3746_s0 = inlined_call_operand.vmem [shape: f32[16,1], index: 0, kind: input, shape index: {}]   ;;  %s3747_s1 = inlined_call_operand.hbm [shape: f32[2,16,128], index: 1, kind: input, shape index: {}]   ;;  %s3748_s2 = inlined_call_operand.hbm [shape: f32[2,16,128], index: 2, kind: input, shape index: {}]   ;;  %s3749_s3 = inlined_call_operand.hbm [shape: f32[16,8,128], index: 3, kind: input, shape index: {}]   ;;  %s3750_s4 = inlined_call_operand.hbm [shape: f32[520,512], index: 4, kind: input, shape index: {}]   ;;  %s3751_s5 = inlined_call_operand.hbm [shape: f32[264,128], index: 5, kind: input, shape index: {}]   ;;  %s3752_s6 = inlined_call_operand.hbm [shape: f32[2,16,128], index: 6, kind: output, shape index: {0}]   ;;  %s3753_s7 = inlined_call_operand.hbm [shape: f32[2,16,128], index: 7, kind: output, shape index: {1}]   ;;  %s3754_s8 = inlined_call_operand.vmem [shape: f32[16,128], index: 8, kind: output, shape index: {2}]  }
   0x1   :  { %15 = vsyncpa [#allocation6], 0 }
   0x2   :  { %16 = vsyncpa [#allocation9], 0 }
   0x3   :  { %17 = vsyncpa [#allocation4], 0 }
   0x4   :  { %18 = vsyncpa [#allocation13], 0  ;;  %s3129_s27 = smov [#allocation5]   ;;  %s3130_s29 = smov [#allocation8]  }
   0x5   :  { %s38_s28 = sshll.u32 %s3129_s27, 4  ;;  %s62_s30 = sshll.u32 %s3130_s29, 4  ;;  %s39_s28 = int_to_ptr.vmem [resolvable:$true] %s38_s28  ;;  %s3187_s30 = int_to_ptr.vmem [resolvable:$true] %s62_s30 }
   0x6   :  { %s2965_s11 = scalar_lea.hbm %s3748_s2, 512 }
   0x7   :  { %p2966_p0 = scmp.ne.s32.totalorder %s3748_s2, %s2965_s11  ;;  %p2969_p1 = scmp.lt.u32.totalorder %s2965_s11, %s3748_s2 }
   0x9   :  { %p2971_p2 = pnand %p2969_p1, %p2966_p0 }
   0xb   :  { %2974 = shalt.err (!%p2971_p2)
}
   0xc   :  { %s2975_s16 = scalar_lea.vmem %s39_s28, 512  ;;  %p2980_p4 = scmp.lt.s32.totalorder %s39_s28, %s39_s28 }
   0xd   :  { %p2976_p3 = scmp.ne.s32.totalorder %s39_s28, %s2975_s16  ;;  %p2981_p5 = scmp.lt.s32.totalorder %s2975_s16, %s2975_s16 }
   0xf   :  { %p2982_p6 = por %p2981_p5, %p2980_p4 }
  0x11   :  { %p2983_p7 = pnand %p2982_p6, %p2976_p3 }
  0x13   :  { %2986 = shalt.err (!%p2983_p7)
}
  0x14   :  { %s3131_s17 = smov 128   ;;  %s3132_s18 = smov 8  }
  0x15   :  { %44 = dma.hbm_to_vmem [thread:$0]  %s3748_s2, 512, %s39_s28, [#allocation6], %s3131_s17, %s3131_s17, %s3132_s18  }
  0x16   :  { %s2987_s23 = scalar_lea.hbm %s3750_s4, 33280 }
  0x17   :  { %p2988_p8 = scmp.ne.s32.totalorder %s3750_s4, %s2987_s23  ;;  %p2991_p9 = scmp.lt.u32.totalorder %s2987_s23, %s3750_s4 }
  0x19   :  { %p2993_p10 = pnand %p2991_p9, %p2988_p8 }
  0x1b   :  { %2996 = shalt.err (!%p2993_p10)
}
  0x1c   :  { %s2997_s29 = scalar_lea.vmem %s3187_s30, 33280  ;;  %p3002_p12 = scmp.lt.s32.totalorder %s3187_s30, %s3187_s30 }
  0x1d   :  { %p2998_p11 = scmp.ne.s32.totalorder %s3187_s30, %s2997_s29  ;;  %p3003_p13 = scmp.lt.s32.totalorder %s2997_s29, %s2997_s29 }
  0x1f   :  { %p3004_p0 = por %p3003_p13, %p3002_p12 }
  0x21   :  { %p3005_p1 = pnand %p3004_p0, %p2998_p11 }
  0x23   :  { %3008 = shalt.err (!%p3005_p1)
}
  0x24   :  { %s3133_s2 = smov 512   ;;  %s3134_s28 = smov 32  }
  0x25   :  { %68 = dma.hbm_to_vmem [thread:$0]  %s3750_s4, 33280, %s3187_s30, [#allocation9], %s3133_s2, %s3133_s2, %s3134_s28  }
  0x26   :  { %s3135_s11 = smov [#allocation2]   ;;  %s3136_s13 = smov [#allocation7]  }
  0x27   :  { %s26_s12 = sshll.u32 %s3135_s11, 4  ;;  %s50_s14 = sshll.u32 %s3136_s13, 4  ;;  %s27_s12 = int_to_ptr.vmem [resolvable:$true] %s26_s12  ;;  %s3221_s14 = int_to_ptr.vmem [resolvable:$true] %s50_s14 }
  0x28   :  { %s3009_s19 = scalar_lea.hbm %s3747_s1, 512 }
  0x29   :  { %p3010_p2 = scmp.ne.s32.totalorder %s3747_s1, %s3009_s19  ;;  %p3013_p3 = scmp.lt.u32.totalorder %s3009_s19, %s3747_s1 }
  0x2b   :  { %p3015_p4 = pnand %p3013_p3, %p3010_p2 }
  0x2d   :  { %3018 = shalt.err (!%p3015_p4)
}
  0x2e   :  { %s3019_s4 = scalar_lea.vmem %s27_s12, 512  ;;  %p3024_p6 = scmp.lt.s32.totalorder %s27_s12, %s27_s12 }
  0x2f   :  { %p3020_p5 = scmp.ne.s32.totalorder %s27_s12, %s3019_s4  ;;  %p3025_p7 = scmp.lt.s32.totalorder %s3019_s4, %s3019_s4 }
  0x31   :  { %p3026_p8 = por %p3025_p7, %p3024_p6 }
  0x33   :  { %p3027_p9 = pnand %p3026_p8, %p3020_p5 }
  0x35   :  { %3030 = shalt.err (!%p3027_p9)
}
  0x36   :  { %32 = dma.hbm_to_vmem [thread:$0]  %s3747_s1, 512, %s27_s12, [#allocation3], %s3131_s17, %s3131_s17, %s3132_s18  }
  0x37   :  { %s3031_s27 = scalar_lea.hbm %s3749_s3, 2048 }
  0x38   :  { %p3032_p10 = scmp.ne.s32.totalorder %s3749_s3, %s3031_s27  ;;  %p3035_p11 = scmp.lt.u32.totalorder %s3031_s27, %s3749_s3 }
  0x3a   :  { %p3037_p12 = pnand %p3035_p11, %p3032_p10 }
  0x3c   :  { %3040 = shalt.err (!%p3037_p12)
}
  0x3d   :  { %s3041_s10 = scalar_lea.vmem %s3221_s14, 2048  ;;  %p3046_p0 = scmp.lt.s32.totalorder %s3221_s14, %s3221_s14 }
  0x3e   :  { %p3042_p13 = scmp.ne.s32.totalorder %s3221_s14, %s3041_s10  ;;  %p3047_p1 = scmp.lt.s32.totalorder %s3041_s10, %s3041_s10 }
  0x40   :  { %p3048_p2 = por %p3047_p1, %p3046_p0 }
  0x42   :  { %p3049_p3 = pnand %p3048_p2, %p3042_p13 }
  0x44   :  { %3052 = shalt.err (!%p3049_p3)
}
  0x45   :  { %56 = dma.hbm_to_vmem [thread:$0]  %s3749_s3, 2048, %s3221_s14, [#allocation6], %s3131_s17, %s3131_s17, %s3132_s18  }
  0x46   :  { %s3137_s12 = smov [#allocation10]   ;;  %s3053_s19 = scalar_lea.hbm %s3751_s5, 4224 }
  0x47   :  { %s74_s13 = sshll.u32 %s3137_s12, 4  ;;  %p3054_p4 = scmp.ne.s32.totalorder %s3751_s5, %s3053_s19  ;;  %s75_s13 = int_to_ptr.vmem [resolvable:$true] %s74_s13 }
  0x48   :  { %p3057_p5 = scmp.lt.u32.totalorder %s3053_s19, %s3751_s5 }
  0x4a   :  { %p3059_p6 = pnand %p3057_p5, %p3054_p4 }
  0x4c   :  { %3062 = shalt.err (!%p3059_p6)
}
  0x4d   :  { %s3063_s4 = scalar_lea.vmem %s75_s13, 4224  ;;  %p3068_p8 = scmp.lt.s32.totalorder %s75_s13, %s75_s13 }
  0x4e   :  { %p3064_p7 = scmp.ne.s32.totalorder %s75_s13, %s3063_s4  ;;  %p3069_p9 = scmp.lt.s32.totalorder %s3063_s4, %s3063_s4 }
  0x50   :  { %p3070_p10 = por %p3069_p9, %p3068_p8 }
  0x52   :  { %p3071_p11 = pnand %p3070_p10, %p3064_p7 }
  0x54   :  { %3074 = shalt.err (!%p3071_p11)
}
  0x55   :  { %80 = dma.hbm_to_vmem [thread:$0]  %s3751_s5, 4224, %s75_s13, [#allocation9], %s3131_s17, %s3131_s17, %s3132_s18  }
  0x56   :  { %3119 = dma.done.wait [#allocation3], 512  }
  0x57   :  { %3120 = vsyncadd [#allocation3], 4294966784 }
  0x58   :  { %3121 = dma.done.wait [#allocation6], 2560  }
  0x59   :  { %3122 = vsyncadd [#allocation6], 4294964736 }
  0x5a   :  { %3123 = dma.done.wait [#allocation9], 37504  }
  0x5b   :  { %3124 = vsyncadd [#allocation9], 4294929792  ;;  %v386_v0 = vld [vmem:[#allocation10] sm:$0xff]  ;;  %v387_v1 = vld [vmem:[#allocation10 + $0x8] sm:$0xff]  ;;  %vm992_vm0 = vcmask 1041409   ;;  %vm994_vm1 = vcmask 1042434  }
  0x5c   :  { %v402_v2 = vld [vmem:[#allocation10 + $0x80] sm:$0xff]  ;;  %v2452_v3 = vpack.c.bf16 %v387_v1, %v386_v0  ;;  %v403_v4 = vld [vmem:[#allocation10 + $0x88] sm:$0xff]  ;;  %v388_v5 = vld [vmem:[#allocation10 + $0x10] sm:$0xff]  ;;  %vm996_vm2 = vcmask 1043459   ;;  %vm998_vm3 = vcmask 1044484   ;;  %vm1000_vm4 = vcmask 1045509  }
  0x5d   :  { %v389_v6 = vld [vmem:[#allocation10 + $0x18] sm:$0xff]  ;;  %v2484_v7 = vpack.c.bf16 %v403_v4, %v402_v2  ;;  %v404_v9 = vld [vmem:[#allocation10 + $0x90] sm:$0xff]  ;;  %v390_v11 = vld [vmem:[#allocation10 + $0x20] sm:$0xff]  ;;  %v3138_v2 = vmov 1966171168   ;;  %v652_v4 = vlaneseq  ;;  %vm1002_vm5 = vcmask 1046534  }
  0x5e   :  { %v2456_v8 = vpack.c.bf16 %v389_v6, %v388_v5  ;;  %v405_v10 = vld [vmem:[#allocation10 + $0x98] sm:$0xff]  ;;  %2453 = vmatprep.subr.bf16.mxu0 %v2452_v3  ;;  %v391_v13 = vld [vmem:[#allocation10 + $0x28] sm:$0xff]  ;;  %v406_v14 = vld [vmem:[#allocation10 + $0xa0] sm:$0xff]  ;;  %vm1004_vm6 = vcmask 1047559   ;;  %vm1015_vm7 = vcmask 64512   ;;  %s3141_s27 = smov [#allocation12]  }
  0x5f   :  { %v2488_v12 = vpack.c.bf16 %v405_v10, %v404_v9  ;;  %v407_v15 = vld [vmem:[#allocation10 + $0xa8] sm:$0xff]  ;;  %2485 = vmatprep.subr.bf16.mxu1 %v2484_v7  ;;  %2455 = vmatpush3.bf16.msra.mxu0 %v2452_v3  ;;  %v2460_v16 = vpack.c.bf16 %v391_v13, %v390_v11  ;;  %v392_v18 = vld [vmem:[#allocation10 + $0x30] sm:$0xff]  ;;  %v393_v19 = vld [vmem:[#allocation10 + $0x38] sm:$0xff]  ;;  %v650_v3 = vunpack.c.l.s4 %v3138_v2  ;;  %v3274_v6 = vshrl.u32 %v652_v4, 7  ;;  %s2273_s29 = sshll.u32 %s3141_s27, 4  ;;  %s3701_s29 = int_to_ptr.vmem [resolvable:$true] %s2273_s29 }
  0x60   :  { %2487 = vmatpush3.bf16.msra.mxu1 %v2484_v7  ;;  %2457 = vmatprep.subr.bf16.mxu0 %v2456_v8  ;;  %v2492_v17 = vpack.c.bf16 %v407_v15, %v406_v14  ;;  %v408_v20 = vld [vmem:[#allocation10 + $0xb0] sm:$0xff]  ;;  %v409_v21 = vld [vmem:[#allocation10 + $0xb8] sm:$0xff]  ;;  %v2464_v22 = vpack.c.bf16 %v393_v19, %v392_v18  ;;  %v394_v24 = vld [vmem:[#allocation10 + $0x40] sm:$0xff] }
  0x61   :  { %2489 = vmatprep.subr.bf16.mxu1 %v2488_v12  ;;  %v2496_v23 = vpack.c.bf16 %v409_v21, %v408_v20  ;;  %v395_v25 = vld [vmem:[#allocation10 + $0x48] sm:$0xff]  ;;  %v101_v26 = vld [vmem:[#allocation2 + $0x10] sm:$0xff]  ;;  %v410_v27 = vld [vmem:[#allocation10 + $0xc0] sm:$0xff]  ;;  %v651_v5 = vunpack.c.0.s8 %v650_v3  ;;  %v3282_v18 = vsub.s32 0, %v3274_v6 }
  0x62   :  { %v411_v28 = vld [vmem:[#allocation10 + $0xc8] sm:$0xff]  ;;  %2393 = vmatprep.mubr.f32.mxu0 %v101_v26  ;;  %v108_v29 = vld [vmem:[#allocation7] sm:$0xff]  ;;  %v2468_v30 = vpack.c.bf16 %v395_v25, %v394_v24  ;;  %v396_v32 = vld [vmem:[#allocation10 + $0x50] sm:$0xff] }
  0x63   :  { %2459 = vmatpush3.bf16.msra.mxu0 %v2456_v8  ;;  %2428 = vmatprep.mubr.f32.mxu1 %v108_v29  ;;  %v2500_v31 = vpack.c.bf16 %v411_v28, %v410_v27  ;;  %v397_v33 = vld [vmem:[#allocation10 + $0x58] sm:$0xff]  ;;  %v412_v34 = vld [vmem:[#allocation10 + $0xd0] sm:$0xff]  ;;  %v398_v38 = vld [vmem:[#allocation10 + $0x60] sm:$0xff]  ;;  %v3277_v8 = vsub.s32 %v651_v5, %v3274_v6 }
  0x64   :  { %2491 = vmatpush3.bf16.msra.mxu1 %v2488_v12  ;;  %2461 = vmatprep.subr.bf16.mxu0 %v2460_v16  ;;  %v413_v35 = vld [vmem:[#allocation10 + $0xd8] sm:$0xff]  ;;  %v2472_v36 = vpack.c.bf16 %v397_v33, %v396_v32  ;;  %v399_v39 = vld [vmem:[#allocation10 + $0x68] sm:$0xff]  ;;  %v414_v40 = vld [vmem:[#allocation10 + $0xe0] sm:$0xff] }
  0x65   :  { %2493 = vmatprep.subr.bf16.mxu1 %v2492_v17  ;;  %v2504_v37 = vpack.c.bf16 %v413_v35, %v412_v34  ;;  %v415_v41 = vld [vmem:[#allocation10 + $0xe8] sm:$0xff]  ;;  %v2476_v42 = vpack.c.bf16 %v399_v39, %v398_v38  ;;  %v400_v44 = vld [vmem:[#allocation10 + $0x70] sm:$0xff]  ;;  %v401_v45 = vld [vmem:[#allocation10 + $0x78] sm:$0xff] }
  0x66   :  { %v2508_v43 = vpack.c.bf16 %v415_v41, %v414_v40  ;;  %v416_v46 = vld [vmem:[#allocation10 + $0xf0] sm:$0xff]  ;;  %v417_v47 = vld [vmem:[#allocation10 + $0xf8] sm:$0xff]  ;;  %v2480_v48 = vpack.c.bf16 %v401_v45, %v400_v44  ;;  %v109_v51 = vld [vmem:[#allocation7 + $0x8] sm:$0xff] }
  0x67   :  { %2463 = vmatpush3.bf16.msra.mxu0 %v2460_v16  ;;  %v2512_v49 = vpack.c.bf16 %v417_v47, %v416_v46  ;;  %v102_v50 = vld [vmem:[#allocation2 + $0x18] sm:$0xff]  ;;  %v110_v52 = vld [vmem:[#allocation7 + $0x10] sm:$0xff]  ;;  %v112_v54 = vld [vmem:[#allocation7 + $0x20] sm:$0xff] }
  0x68   :  { %2495 = vmatpush3.bf16.msra.mxu1 %v2492_v17  ;;  %2465 = vmatprep.subr.bf16.mxu0 %v2464_v22  ;;  %v111_v53 = vld [vmem:[#allocation7 + $0x18] sm:$0xff]  ;;  %v113_v55 = vld [vmem:[#allocation7 + $0x28] sm:$0xff]  ;;  %v114_v56 = vld [vmem:[#allocation7 + $0x30] sm:$0xff] }
  0x69   :  { %2497 = vmatprep.subr.bf16.mxu1 %v2496_v23  ;;  %v115_v57 = vld [vmem:[#allocation7 + $0x38] sm:$0xff]  ;;  %v116_v58 = vld [vmem:[#allocation7 + $0x40] sm:$0xff]  ;;  %v117_v59 = vld [vmem:[#allocation7 + $0x48] sm:$0xff] }
  0x6a   :  { %v118_v60 = vld [vmem:[#allocation7 + $0x50] sm:$0xff]  ;;  %v119_v61 = vld [vmem:[#allocation7 + $0x58] sm:$0xff]  ;;  %v120_v62 = vld [vmem:[#allocation7 + $0x60] sm:$0xff] }
  0x6b   :  { %2467 = vmatpush3.bf16.msra.mxu0 %v2464_v22  ;;  %v121_v63 = vld [vmem:[#allocation7 + $0x68] sm:$0xff]  ;;  %v122_v0 = vld [vmem:[#allocation7 + $0x70] sm:$0xff]  ;;  %v123_v1 = vld [vmem:[#allocation7 + $0x78] sm:$0xff] }
  0x6c   :  { %2499 = vmatpush3.bf16.msra.mxu1 %v2496_v23  ;;  %2469 = vmatprep.subr.bf16.mxu0 %v2468_v30  ;;  %v2295_v7 = vld [vmem:[#allocation10 + $0x101] ss:$0 sm:$0xff]  ;;  %v3304_v5 = vld [vmem:[#allocation10 + $0x100] ss:$0 sm:$0xff] }
  0x6d   :  { %2501 = vmatprep.subr.bf16.mxu1 %v2500_v31 }
  0x6f   :  { %2471 = vmatpush3.bf16.msra.mxu0 %v2468_v30 }
  0x70   :  { %2503 = vmatpush3.bf16.msra.mxu1 %v2500_v31  ;;  %2473 = vmatprep.subr.bf16.mxu0 %v2472_v36 }
  0x71   :  { %2505 = vmatprep.subr.bf16.mxu1 %v2504_v37 }
  0x73   :  { %2475 = vmatpush3.bf16.msra.mxu0 %v2472_v36 }
  0x74   :  { %2507 = vmatpush3.bf16.msra.mxu1 %v2504_v37  ;;  %2477 = vmatprep.subr.bf16.mxu0 %v2476_v42 }
  0x75   :  { %2509 = vmatprep.subr.bf16.mxu1 %v2508_v43 }
  0x77   :  { %2479 = vmatpush3.bf16.msra.mxu0 %v2476_v42 }
  0x78   :  { %2511 = vmatpush3.bf16.msra.mxu1 %v2508_v43  ;;  %2481 = vmatprep.subr.bf16.mxu0 %v2480_v48 }
  0x79   :  { %2513 = vmatprep.subr.bf16.mxu1 %v2512_v49 }
  0x7b   :  { %2483 = vmatpush3.bf16.msra.mxu0 %v2480_v48 }
  0x7c   :  { %2515 = vmatpush3.bf16.msra.mxu1 %v2512_v49 }
  0x7e   :  { %2394 = vmatmul.mubr.f32.vlgmr.msra.gmra.mrb[0].mxu0 %v102_v50 }
  0x7f   :  { %2429 = vmatmul.mubr.f32.vlgmr.msra.gmra.mrb[0].mxu1 %v109_v51 }
  0x80   :  { %2431 = vmatprep.mubr.f32.mxu1 %v110_v52 }
  0x83   :  { %2432 = vmatmul.mubr.f32.gmra.mrb[2].mxu1 %v111_v53 }
  0x84   :  { %2434 = vmatprep.mubr.f32.mxu1 %v112_v54 }
  0x87   :  { %2435 = vmatmul.mubr.f32.gmra.mrb[4].mxu1 %v113_v55 }
  0x88   :  { %2437 = vmatprep.mubr.f32.mxu1 %v114_v56 }
  0x8b   :  { %2438 = vmatmul.mubr.f32.gmra.mrb[6].mxu1 %v115_v57 }
  0x8c   :  { %2440 = vmatprep.mubr.f32.mxu1 %v116_v58 }
  0x8f   :  { %2441 = vmatmul.mubr.f32.gmra.mrb[8].mxu1 %v117_v59 }
  0x90   :  { %2443 = vmatprep.mubr.f32.mxu1 %v118_v60 }
  0x93   :  { %2444 = vmatmul.mubr.f32.gmra.mrb[10].mxu1 %v119_v61 }
  0x94   :  { %2446 = vmatprep.mubr.f32.mxu1 %v120_v62 }
  0x97   :  { %2447 = vmatmul.mubr.f32.gmra.mrb[12].mxu1 %v121_v63 }
  0x98   :  { %2449 = vmatprep.mubr.f32.mxu1 %v122_v0 }
  0x9b   :  { %2450 = vmatmul.mubr.f32.gmra.mrb[14].mxu1 %v123_v1 }
 0x151   :  { %v2395_v9 = vpop.f32.mrb[0].mxu0 }
 0x152   :  { %v498_v10 = vadd.f32 %v2395_v9, %v2295_v7  ;;  %v492_v11 = vpop.f32.mrb[1].mxu0  ;;  %v2430_v12 = vpop.f32.mrb[0].mxu1 }
 0x153   :  { %v493_v13 = vadd.f32 %v2295_v7, %v492_v11  ;;  %v567_v14 = vpop.f32.mrb[1].mxu1 }
 0x154   :  { %v704_v15 = vrot.slane %v498_v10, %v3277_v8  ;;  %v697_v19 = vcombine.high %v498_v10, %v498_v10 }
 0x155   :  { %v648_v16 = vcombine.high %v493_v13, %v493_v13  ;;  %v655_v17 = vrot.slane %v493_v13, %v3277_v8 }
 0x156   :  { %v2433_v20 = vpop.f32.mrb[2].mxu1  ;;  %v712_v25 = vcombine.high %v704_v15, %v704_v15  ;;  %v711_v30 = vrot.slane %v697_v19, %v3277_v8  ;;  %v720_v33 = vrot.slane %v704_v15, %v3277_v8 }
 0x157   :  { %v662_v21 = vrot.slane %v648_v16, %v3277_v8  ;;  %v663_v22 = vcombine.high %v655_v17, %v655_v17  ;;  %v671_v23 = vrot.slane %v655_v17, %v3277_v8  ;;  %v577_v24 = vpop.f32.mrb[3].mxu1 }
 0x158   :  { %v734_v42 = vrot.slane %v712_v25, %v3277_v8  ;;  %v713_v58 = vcombine.high %v711_v30, %v711_v30  ;;  %v781_v61 = vrot.slane %v720_v33, %v3282_v18  ;;  %v742_v62 = vcombine.high %v720_v33, %v720_v33 }
 0x159   :  { %v685_v26 = vrot.slane %v663_v22, %v3277_v8  ;;  %v749_v27 = vrot.slane %v671_v23, %v3282_v18  ;;  %v693_v28 = vcombine.high %v671_v23, %v671_v23  ;;  %v664_v29 = vcombine.high %v662_v21, %v662_v21 }
 0x15a   :  { %v2436_v31 = vpop.f32.mrb[4].mxu1  ;;  %v678_v32 = vrot.slane %v662_v21, %v3277_v8  ;;  %v785_v56 = vrot.slane %v734_v42, %v3282_v18  ;;  %v744_v57 = vcombine.high %v734_v42, %v734_v42  ;;  %v741_v3 = vrot.slane %v713_v58, %v3277_v8 }
 0x15b   :  { %v753_v34 = vrot.slane %v685_v26, %v3282_v18  ;;  %v826_v35 = vadd.f32 %v749_v27, %v567_v14  ;;  %v695_v36 = vcombine.high %v685_v26, %v685_v26  ;;  %v757_v37 = vrot.slane %v693_v28, %v3282_v18  ;;  %v587_v38 = vpop.f32.mrb[5].mxu1 }
 0x15c   :  { %v692_v39 = vrot.slane %v664_v29, %v3277_v8  ;;  %v765_v40 = vrot.slane %v678_v32, %v3282_v18  ;;  %v694_v41 = vcombine.high %v678_v32, %v678_v32  ;;  %v793_v2 = vrot.slane %v744_v57, %v3282_v18 }
 0x15d   :  { %v827_v43 = vadd.f32 %v2430_v12, %v753_v34  ;;  %2787 = vtanh.f32 %v826_v35  ;;  %v761_v44 = vrot.slane %v695_v36, %v3282_v18  ;;  %v828_v45 = vadd.f32 %v757_v37, %v577_v24 }
 0x15e   :  { %v769_v46 = vrot.slane %v692_v39, %v3282_v18  ;;  %v830_v47 = vadd.f32 %v765_v40, %v587_v38  ;;  %v2439_v48 = vpop.f32.mrb[6].mxu1  ;;  %v696_v49 = vcombine.high %v692_v39, %v692_v39  ;;  %v773_v50 = vrot.slane %v694_v41, %v3282_v18 }
 0x15f   :  { %2789 = vtanh.f32 %v827_v43  ;;  %v829_v51 = vadd.f32 %v2433_v20, %v761_v44  ;;  %v597_v52 = vpop.f32.mrb[7].mxu1  ;;  %v789_v9 = vrot.slane %v742_v62, %v3282_v18  ;;  %v727_v10 = vrot.slane %v711_v30, %v3277_v8 }
 0x160   :  { %2791 = vtanh.f32 %v828_v45  ;;  %v831_v53 = vadd.f32 %v2436_v31, %v769_v46  ;;  %v777_v54 = vrot.slane %v696_v49, %v3282_v18  ;;  %v832_v55 = vadd.f32 %v773_v50, %v597_v52 }
 0x161   :  { %2793 = vtanh.f32 %v829_v51  ;;  %v801_v17 = vrot.slane %v741_v3, %v3282_v18  ;;  %v745_v19 = vcombine.high %v741_v3, %v741_v3  ;;  %v797_v22 = vrot.slane %v727_v10, %v3282_v18 }
 0x162   :  { %v833_v59 = vadd.f32 %v2439_v48, %v777_v54  ;;  %v2442_v60 = vpop.f32.mrb[8].mxu1  ;;  %2795 = vtanh.f32 %v830_v47  ;;  %v743_v23 = vcombine.high %v727_v10, %v727_v10 }
 0x163   :  { %v835_v63 = vadd.f32 %v2442_v60, %v785_v56  ;;  %v607_v0 = vpop.f32.mrb[9].mxu1  ;;  %2797 = vtanh.f32 %v831_v53  ;;  %v809_v30 = vrot.slane %v745_v19, %v3282_v18  ;;  %v3329_v60 = vand.u32 127, %v652_v4 }
 0x164   :  { %v834_v1 = vadd.f32 %v781_v61, %v607_v0  ;;  %2799 = vtanh.f32 %v832_v55  ;;  %v805_v32 = vrot.slane %v743_v23, %v3282_v18 }
 0x165   :  { %2801 = vtanh.f32 %v835_v63  ;;  %v3335_v62 = vsub.s32 %v3329_v60, %v3274_v6 }
 0x166   :  { %v2445_v7 = vpop.f32.mrb[10].mxu1  ;;  %2803 = vtanh.f32 %v833_v59 }
 0x167   :  { %v2788_v11 = vpop.eup %2787  ;;  %v837_v12 = vadd.f32 %v2445_v7, %v793_v2  ;;  %v617_v13 = vpop.f32.mrb[11].mxu1 }
 0x168   :  { %v836_v14 = vadd.f32 %v789_v9, %v617_v13  ;;  %v862_v15 = vmul.f32 %v2788_v11, %v3304_v5 }
 0x169   :  { %v2790_v16 = vpop.eup %2789  ;;  %2805 = vtanh.f32 %v837_v12 }
 0x16a   :  { %v2792_v20 = vpop.eup %2791  ;;  %v2448_v21 = vpop.f32.mrb[12].mxu1  ;;  %878 = vadd.xlane.f32.xlu0 %v862_v15  ;;  %v863_v28 = vmul.f32 %v2790_v16, %v3304_v5  ;;  %2807 = vtanh.f32 %v834_v1 }
 0x16b   :  { %v839_v8 = vadd.f32 %v2448_v21, %v801_v17  ;;  %v627_v24 = vpop.f32.mrb[13].mxu1  ;;  %v864_v25 = vmul.f32 %v2792_v20, %v3304_v5  ;;  %v2794_v26 = vpop.eup %2793  ;;  %2809 = vtanh.f32 %v836_v14 }
 0x16c   :  { %v838_v27 = vadd.f32 %v797_v22, %v627_v24  ;;  %v2796_v29 = vpop.eup %2795  ;;  %v865_v35 = vmul.f32 %v2794_v26, %v3304_v5 }
 0x16d   :  { %882 = vadd.xlane.f32.xlu1 %v864_v25  ;;  %v2798_v36 = vpop.eup %2797  ;;  %v866_v38 = vmul.f32 %v2796_v29, %v3304_v5 }
 0x16e   :  { %v2451_v31 = vpop.f32.mrb[14].mxu1  ;;  %880 = vadd.xlane.f32.xlu0 %v863_v28  ;;  %v2800_v39 = vpop.eup %2799  ;;  %2811 = vtanh.f32 %v838_v27  ;;  %v867_v40 = vmul.f32 %v2798_v36, %v3304_v5 }
 0x16f   :  { %v841_v33 = vadd.f32 %v2451_v31, %v809_v30  ;;  %v637_v34 = vpop.f32.mrb[15].mxu1  ;;  %v2802_v41 = vpop.eup %2801  ;;  %v868_v42 = vmul.f32 %v2800_v39, %v3304_v5  ;;  %2813 = vtanh.f32 %v839_v8 }
 0x170   :  { %v840_v37 = vadd.f32 %v805_v32, %v637_v34  ;;  %v2804_v43 = vpop.eup %2803  ;;  %v871_v44 = vmul.f32 %v2802_v41, %v3304_v5 }
 0x171   :  { %884 = vadd.xlane.f32.xlu1 %v865_v35  ;;  %v869_v46 = vmul.f32 %v2804_v43, %v3304_v5 }
 0x172   :  { %886 = vadd.xlane.f32.xlu0 %v866_v38  ;;  %2815 = vtanh.f32 %v840_v37 }
 0x173   :  { %v2806_v45 = vpop.eup %2805  ;;  %2817 = vtanh.f32 %v841_v33 }
 0x174   :  { %v2808_v47 = vpop.eup %2807  ;;  %v873_v48 = vmul.f32 %v2806_v45, %v3304_v5 }
 0x175   :  { %888 = vadd.xlane.f32.xlu1 %v867_v40  ;;  %v2810_v49 = vpop.eup %2809  ;;  %v870_v50 = vmul.f32 %v2808_v47, %v3304_v5 }
 0x176   :  { %890 = vadd.xlane.f32.xlu0 %v868_v42  ;;  %v872_v52 = vmul.f32 %v2810_v49, %v3304_v5  ;;  %v3413_v49 = vsub.s32 1, %v3274_v6 }
 0x178   :  { %v2812_v51 = vpop.eup %2811 }
 0x179   :  { %896 = vadd.xlane.f32.xlu1 %v871_v44  ;;  %v2814_v53 = vpop.eup %2813  ;;  %v874_v54 = vmul.f32 %v2812_v51, %v3304_v5  ;;  %v3419_v51 = vsub.s32 3, %v3274_v6 }
 0x17a   :  { %892 = vadd.xlane.f32.xlu0 %v869_v46  ;;  %v875_v56 = vmul.f32 %v2814_v53, %v3304_v5 }
 0x17c   :  { %v2816_v55 = vpop.eup %2815 }
 0x17d   :  { %900 = vadd.xlane.f32.xlu1 %v873_v48  ;;  %v2818_v57 = vpop.eup %2817  ;;  %v876_v58 = vmul.f32 %v2816_v55, %v3304_v5  ;;  %v3139_v48 = vmov 0  }
 0x17e   :  { %894 = vadd.xlane.f32.xlu0 %v870_v50  ;;  %v877_v59 = vmul.f32 %v2818_v57, %v3304_v5  ;;  %2786 = vset.pattern.permute.xlu1 %v3139_v48  ;;  %v3416_v50 = vsub.s32 2, %v3274_v6 }
 0x17f   :  { %2785 = vset.pattern.permute.xlu0 %v3139_v48 }
 0x181   :  { %898 = vadd.xlane.f32.xlu1 %v872_v52 }
 0x182   :  { %902 = vadd.xlane.f32.xlu0 %v874_v54 }
 0x185   :  { %904 = vadd.xlane.f32.xlu1 %v875_v56 }
 0x186   :  { %906 = vadd.xlane.f32.xlu0 %v876_v58  ;;  %v3427_v58 = vsub.s32 4, %v3274_v6 }
 0x189   :  { %908 = vadd.xlane.f32.xlu1 %v877_v59 }
 0x1f7   :  { %v3331_v61 = vpop.xlane.xlu0 %878 }
 0x1f8   :  { %v931_v1 = vrot.slane %v3331_v61, %v3335_v62 }
 0x1fa   :  { %v3337_v63 = vpop.xlane.xlu1 %882 }
 0x1fb   :  { %v3339_v0 = vpop.xlane.xlu0 %880  ;;  %v939_v4 = vrot.slane %v3337_v63, %v3335_v62 }
 0x1fc   :  { %v935_v2 = vrot.slane %v3339_v0, %v3335_v62 }
 0x1fe   :  { %v993_v3 = vsel %vm992_vm0, %v935_v2, %v931_v1  ;;  %v3348_v5 = vpop.xlane.xlu1 %884 }
 0x1ff   :  { %v995_v7 = vsel %vm994_vm1, %v939_v4, %v993_v3  ;;  %v943_v9 = vrot.slane %v3348_v5, %v3335_v62  ;;  %v3353_v10 = vpop.xlane.xlu0 %886  ;;  %v3432_v3 = vsub.s32 5, %v3274_v6 }
 0x200   :  { %v947_v11 = vrot.slane %v3353_v10, %v3335_v62 }
 0x201   :  { %v997_v12 = vsel %vm996_vm2, %v943_v9, %v995_v7 }
 0x202   :  { %v3358_v13 = vpop.xlane.xlu1 %888  ;;  %v999_v14 = vsel %vm998_vm3, %v947_v11, %v997_v12 }
 0x203   :  { %v951_v15 = vrot.slane %v3358_v13, %v3335_v62  ;;  %v3363_v16 = vpop.xlane.xlu0 %890 }
 0x204   :  { %v955_v17 = vrot.slane %v3363_v16, %v3335_v62 }
 0x205   :  { %v1001_v20 = vsel %vm1000_vm4, %v951_v15, %v999_v14  ;;  %v3442_v14 = vsub.s32 7, %v3274_v6 }
 0x206   :  { %v3367_v19 = vpop.xlane.xlu1 %896  ;;  %v1003_v23 = vsel %vm1002_vm5, %v955_v17, %v1001_v20 }
 0x207   :  { %v3370_v21 = vpop.xlane.xlu0 %892  ;;  %v967_v27 = vrot.slane %v3367_v19, %v3335_v62 }
 0x208   :  { %v959_v22 = vrot.slane %v3370_v21, %v3335_v62 }
 0x20a   :  { %v3375_v8 = vpop.xlane.xlu1 %900  ;;  %v1005_v24 = vsel %vm1004_vm6, %v959_v22, %v1003_v23 }
 0x20b   :  { %v3378_v25 = vpop.xlane.xlu0 %894  ;;  %v1016_v26 = vsel %vm1015_vm7, %v1005_v24, -inf  ;;  %v975_v33 = vrot.slane %v3375_v8, %v3335_v62 }
 0x20c   :  { %v963_v28 = vrot.slane %v3378_v25, %v3335_v62  ;;  %1017 = vmax.xlane.f32.xlu0 %v1016_v26 }
 0x20e   :  { %v1006_v29 = vsel %vm992_vm0, %v967_v27, %v963_v28  ;;  %v899_v30 = vpop.xlane.xlu1 %898 }
 0x20f   :  { %v971_v31 = vrot.slane %v899_v30, %v3335_v62  ;;  %v3387_v32 = vpop.xlane.xlu0 %902 }
 0x210   :  { %v979_v34 = vrot.slane %v3387_v32, %v3335_v62 }
 0x211   :  { %v1007_v35 = vsel %vm994_vm1, %v971_v31, %v1006_v29 }
 0x212   :  { %v1008_v36 = vsel %vm996_vm2, %v975_v33, %v1007_v35  ;;  %v3395_v37 = vpop.xlane.xlu1 %904 }
 0x213   :  { %v1009_v38 = vsel %vm998_vm3, %v979_v34, %v1008_v36  ;;  %v983_v39 = vrot.slane %v3395_v37, %v3335_v62  ;;  %v3400_v40 = vpop.xlane.xlu0 %906 }
 0x214   :  { %v987_v41 = vrot.slane %v3400_v40, %v3335_v62 }
 0x215   :  { %v1010_v42 = vsel %vm1000_vm4, %v983_v39, %v1009_v38 }
 0x216   :  { %v3405_v43 = vpop.xlane.xlu1 %908  ;;  %v1011_v44 = vsel %vm1002_vm5, %v987_v41, %v1010_v42 }
 0x217   :  { %v991_v45 = vrot.slane %v3405_v43, %v3335_v62 }
 0x219   :  { %v1012_v46 = vsel %vm1004_vm6, %v991_v45, %v1011_v44 }
 0x21a   :  { %v1019_v47 = vsel %vm1015_vm7, %v1012_v46, -inf }
 0x21b   :  { %1020 = vmax.xlane.f32.xlu1 %v1019_v47 }
 0x299   :  { %v1018_v52 = vpop.xlane.xlu0 %1017 }
 0x29a   :  { %v1027_v53 = vrot.slane %v1018_v52, %v3282_v18  ;;  %v1031_v54 = vrot.slane %v1018_v52, %v3413_v49  ;;  %v1035_v55 = vrot.slane %v1018_v52, %v3416_v50  ;;  %v1039_v59 = vrot.slane %v1018_v52, %v3419_v51 }
 0x29b   :  { %v1043_v7 = vrot.slane %v1018_v52, %v3427_v58  ;;  %v1047_v11 = vrot.slane %v1018_v52, %v3432_v3  ;;  %v1055_v27 = vrot.slane %v1018_v52, %v3442_v14 }
 0x29c   :  { %v1104_v56 = vsub.f32 %v3331_v61, %v1027_v53  ;;  %v1105_v57 = vsub.f32 %v3339_v0, %v1031_v54  ;;  %v1106_v1 = vsub.f32 %v3337_v63, %v1035_v55  ;;  %v1107_v9 = vsub.f32 %v3348_v5, %v1039_v59 }
 0x29d   :  { %v3437_v0 = vsub.s32 6, %v3274_v6  ;;  %v1108_v12 = vsub.f32 %v3353_v10, %v1043_v7  ;;  %v1109_v17 = vsub.f32 %v3358_v13, %v1047_v11  ;;  %v1111_v35 = vsub.f32 %v3370_v21, %v1055_v27 }
 0x29e   :  { %v1120_v2 = vmul.f32 1.442695, %v1104_v56  ;;  %v1122_v4 = vmul.f32 1.442695, %v1105_v57  ;;  %v1124_v61 = vmul.f32 1.442695, %v1106_v1 }
 0x29f   :  { %v1126_v63 = vmul.f32 1.442695, %v1107_v9  ;;  %v1051_v15 = vrot.slane %v1018_v52, %v3437_v0  ;;  %v1128_v5 = vmul.f32 1.442695, %v1108_v12  ;;  %v1130_v29 = vmul.f32 1.442695, %v1109_v17 }
 0x2a0   :  { %2819 = vpow2.f32 %v1120_v2 }
 0x2a1   :  { %2821 = vpow2.f32 %v1122_v4  ;;  %v1110_v28 = vsub.f32 %v3363_v16, %v1051_v15 }
 0x2a2   :  { %2823 = vpow2.f32 %v1124_v61 }
 0x2a3   :  { %2825 = vpow2.f32 %v1126_v63 }
 0x2a4   :  { %2827 = vpow2.f32 %v1128_v5 }
 0x2a5   :  { %2829 = vpow2.f32 %v1130_v29 }
 0x2a8   :  { %v1021_v20 = vpop.xlane.xlu1 %1020 }
 0x2a9   :  { %v1067_v22 = vrot.slane %v1021_v20, %v3416_v50  ;;  %v1071_v23 = vrot.slane %v1021_v20, %v3419_v51  ;;  %v1079_v13 = vrot.slane %v1021_v20, %v3432_v3  ;;  %v1059_v36 = vrot.slane %v1021_v20, %v3282_v18 }
 0x2aa   :  { %v3448_v24 = vpop.eup %2819  ;;  %v1087_v16 = vrot.slane %v1021_v20, %v3442_v14  ;;  %v1063_v21 = vrot.slane %v1021_v20, %v3413_v49  ;;  %v1075_v47 = vrot.slane %v1021_v20, %v3427_v58 }
 0x2ab   :  { %v3450_v26 = vpop.eup %2821  ;;  %v1114_v10 = vsub.f32 %v899_v30, %v1067_v22  ;;  %1169 = vperm.xlu0 %2785, %v3448_v24   ;;  %v1115_v31 = vsub.f32 %v3375_v8, %v1071_v23  ;;  %v1132_v30 = vmul.f32 1.442695, %v1110_v28  ;;  %v1117_v38 = vsub.f32 %v3395_v37, %v1079_v13 }
 0x2ac   :  { %1172 = vperm.xlu1 %2786, %v3450_v26   ;;  %v3458_v34 = vpop.eup %2823  ;;  %v1134_v8 = vmul.f32 1.442695, %v1111_v35  ;;  %v1112_v42 = vsub.f32 %v3378_v25, %v1059_v36  ;;  %v1119_v44 = vsub.f32 %v3405_v43, %v1087_v16  ;;  %v1113_v48 = vsub.f32 %v3367_v19, %v1063_v21 }
 0x2ad   :  { %v1140_v33 = vmul.f32 1.442695, %v1114_v10  ;;  %v1142_v39 = vmul.f32 1.442695, %v1115_v31  ;;  %v3465_v41 = vpop.eup %2825  ;;  %v1146_v45 = vmul.f32 1.442695, %v1117_v38  ;;  %v1083_v43 = vrot.slane %v1021_v20, %v3437_v0 }
 0x2ae   :  { %v3471_v46 = vpop.eup %2827  ;;  %v1136_v37 = vmul.f32 1.442695, %v1112_v42  ;;  %v1150_v25 = vmul.f32 1.442695, %v1119_v44  ;;  %v1116_v54 = vsub.f32 %v3387_v32, %v1075_v47  ;;  %v1138_v55 = vmul.f32 1.442695, %v1113_v48 }
 0x2af   :  { %2831 = vpow2.f32 %v1140_v33  ;;  %v3476_v52 = vpop.eup %2829  ;;  %v1118_v57 = vsub.f32 %v3400_v40, %v1083_v43 }
 0x2b0   :  { %1175 = vperm.xlu1 %2786, %v3458_v34   ;;  %2833 = vpow2.f32 %v1132_v30  ;;  %v1144_v59 = vmul.f32 1.442695, %v1116_v54 }
 0x2b1   :  { %2835 = vpow2.f32 %v1142_v39  ;;  %v1148_v32 = vmul.f32 1.442695, %v1118_v57 }
 0x2b2   :  { %2837 = vpow2.f32 %v1134_v8 }
 0x2b3   :  { %2839 = vpow2.f32 %v1146_v45 }
 0x2b4   :  { %1178 = vperm.xlu1 %2786, %v3465_v41   ;;  %2841 = vpow2.f32 %v1136_v37 }
 0x2b5   :  { %2843 = vpow2.f32 %v1150_v25 }
 0x2b6   :  { %2845 = vpow2.f32 %v1138_v55 }
 0x2b7   :  { %2847 = vpow2.f32 %v1144_v59 }
 0x2b8   :  { %1181 = vperm.xlu1 %2786, %v3471_v46   ;;  %2849 = vpow2.f32 %v1148_v32 }
 0x2b9   :  { %v3478_v53 = vpop.eup %2831 }
 0x2ba   :  { %1199 = vperm.xlu0 %2785, %v3478_v53   ;;  %v3484_v56 = vpop.eup %2833 }
 0x2bb   :  { %v3486_v19 = vpop.eup %2835 }
 0x2bc   :  { %1184 = vperm.xlu1 %2786, %v3476_v52   ;;  %v3491_v1 = vpop.eup %2837 }
 0x2bd   :  { %v3493_v2 = vpop.eup %2839 }
 0x2be   :  { %1202 = vperm.xlu0 %2785, %v3486_v19   ;;  %v3497_v4 = vpop.eup %2841 }
 0x2bf   :  { %v3499_v7 = vpop.eup %2843 }
 0x2c0   :  { %1187 = vperm.xlu1 %2786, %v3484_v56   ;;  %v3503_v40 = vpop.eup %2845 }
 0x2c1   :  { %v3506_v9 = vpop.eup %2847 }
 0x2c2   :  { %1208 = vperm.xlu0 %2785, %v3493_v2   ;;  %v3509_v61 = vpop.eup %2849 }
 0x2c4   :  { %1190 = vperm.xlu1 %2786, %v3491_v1  }
 0x2c6   :  { %1214 = vperm.xlu0 %2785, %v3499_v7  }
 0x2c8   :  { %1193 = vperm.xlu1 %2786, %v3497_v4  }
 0x2cc   :  { %1196 = vperm.xlu1 %2786, %v3503_v40  }
 0x2d0   :  { %1205 = vperm.xlu1 %2786, %v3506_v9  }
 0x2d4   :  { %1211 = vperm.xlu1 %2786, %v3509_v61  }
 0x32a   :  { %v1170_v17 = vpop.permute.xlu0 %1169 }
 0x32b   :  { %v1173_v11 = vpop.permute.xlu1 %1172  ;;  %v1219_v22 = vrot.slane %v1170_v17, %v3335_v62 }
 0x32c   :  { %v1223_v5 = vrot.slane %v1173_v11, %v3335_v62 }
 0x32e   :  { %v1280_v29 = vsel %vm992_vm0, %v1223_v5, %v1219_v22 }
 0x32f   :  { %v1176_v12 = vpop.permute.xlu1 %1175 }
 0x330   :  { %v1227_v23 = vrot.slane %v1176_v12, %v3335_v62 }
 0x332   :  { %v1281_v33 = vsel %vm994_vm1, %v1227_v23, %v1280_v29  ;;  %v129_v29 = vld [vmem:[#allocation8 + $0x28] sm:$0xff] }
 0x333   :  { %v1179_v63 = vpop.permute.xlu1 %1178 }
 0x334   :  { %v1231_v10 = vrot.slane %v1179_v63, %v3335_v62 }
 0x336   :  { %v1282_v30 = vsel %vm996_vm2, %v1231_v10, %v1281_v33  ;;  %v131_v33 = vld [vmem:[#allocation8 + $0x38] sm:$0xff] }
 0x337   :  { %v1182_v15 = vpop.permute.xlu1 %1181 }
 0x338   :  { %v1235_v27 = vrot.slane %v1182_v15, %v3335_v62 }
 0x339   :  { %v1200_v13 = vpop.permute.xlu0 %1199 }
 0x33a   :  { %v1283_v36 = vsel %vm998_vm3, %v1235_v27, %v1282_v30  ;;  %v1259_v43 = vrot.slane %v1200_v13, %v3335_v62  ;;  %v127_v13 = vld [vmem:[#allocation8 + $0x18] sm:$0xff]  ;;  %v128_v30 = vld [vmem:[#allocation8 + $0x20] sm:$0xff] }
 0x33b   :  { %v1185_v20 = vpop.permute.xlu1 %1184 }
 0x33c   :  { %v1239_v31 = vrot.slane %v1185_v20, %v3335_v62 }
 0x33d   :  { %v1203_v42 = vpop.permute.xlu0 %1202 }
 0x33e   :  { %v1284_v38 = vsel %vm1000_vm4, %v1239_v31, %v1283_v36  ;;  %v1263_v54 = vrot.slane %v1203_v42, %v3335_v62  ;;  %v2580_v36 = vpack.c.bf16 %v131_v33, %v127_v13  ;;  %v137_v42 = vld [vmem:[#allocation8 + $0x68] sm:$0xff]  ;;  %v155_v13 = vld [vmem:[#allocation8 + $0xf8] sm:$0xff]  ;;  %v152_v33 = vld [vmem:[#allocation8 + $0xe0] sm:$0xff] }
 0x33f   :  { %v1188_v28 = vpop.permute.xlu1 %1187 }
 0x340   :  { %v1243_v35 = vrot.slane %v1188_v28, %v3335_v62  ;;  %v125_v28 = vld [vmem:[#allocation8 + $0x8] sm:$0xff]  ;;  %2581 = vmatprep.subr.bf16.mxu1 %v2580_v36  ;;  %v154_v36 = vld [vmem:[#allocation8 + $0xf0] sm:$0xff] }
 0x341   :  { %v1209_v47 = vpop.permute.xlu0 %1208  ;;  %v2516_v31 = vpack.c.bf16 %v129_v29, %v125_v28 }
 0x342   :  { %v1285_v8 = vsel %vm1002_vm5, %v1243_v35, %v1284_v38  ;;  %v1271_v15 = vrot.slane %v1209_v47, %v3335_v62  ;;  %v124_v35 = vld [vmem:[#allocation8] sm:$0xff]  ;;  %v126_v38 = vld [vmem:[#allocation8 + $0x10] sm:$0xff] }
 0x343   :  { %v1191_v16 = vpop.permute.xlu1 %1190  ;;  %2517 = vmatprep.subr.bf16.mxu0 %v2516_v31  ;;  %v132_v47 = vld [vmem:[#allocation8 + $0x40] sm:$0xff] }
 0x344   :  { %v1247_v39 = vrot.slane %v1191_v16, %v3335_v62  ;;  %v2518_v16 = vpack.c.bf16 %v128_v30, %v124_v35  ;;  %v148_v31 = vld [vmem:[#allocation8 + $0xc0] sm:$0xff]  ;;  %v150_v30 = vld [vmem:[#allocation8 + $0xd0] sm:$0xff] }
 0x345   :  { %v1215_v12 = vpop.permute.xlu0 %1214 }
 0x346   :  { %v1286_v21 = vsel %vm1004_vm6, %v1247_v39, %v1285_v8  ;;  %v1279_v5 = vrot.slane %v1215_v12, %v3335_v62  ;;  %v133_v39 = vld [vmem:[#allocation8 + $0x48] sm:$0xff]  ;;  %2519 = vmatpush1.bf16.msra.mxu0 %v2518_v16  ;;  %v147_v12 = vld [vmem:[#allocation8 + $0xb8] sm:$0xff] }
 0x347   :  { %v1194_v44 = vpop.permute.xlu1 %1193  ;;  %v1296_v45 = vsel %vm1015_vm7, %v1286_v21, 0.0  ;;  %v135_v21 = vld [vmem:[#allocation8 + $0x58] sm:$0xff]  ;;  %v157_v16 = vld [vmem:[#allocation8 + $0x108] sm:$0xff] }
 0x348   :  { %1297 = vadd.xlane.f32.xlu1 %v1296_v45  ;;  %v1251_v48 = vrot.slane %v1194_v44, %v3335_v62  ;;  %v139_v44 = vld [vmem:[#allocation8 + $0x78] sm:$0xff]  ;;  %v2520_v45 = vpack.c.bf16 %v137_v42, %v133_v39  ;;  %v2594_v42 = vpack.c.bf16 %v154_v36, %v150_v30  ;;  %v181_v30 = vld [vmem:[#allocation8 + $0x1c8] sm:$0xff] }
 0x349   :  { %v163_v39 = vld [vmem:[#allocation8 + $0x138] sm:$0xff]  ;;  %v185_v36 = vld [vmem:[#allocation8 + $0x1e8] sm:$0xff] }
 0x34a   :  { %2521 = vmatprep.subr.bf16.mxu0 %v2520_v45  ;;  %v160_v45 = vld [vmem:[#allocation8 + $0x120] sm:$0xff] }
 0x34b   :  { %v1197_v37 = vpop.permute.xlu1 %1196 }
 0x34c   :  { %v1255_v25 = vrot.slane %v1197_v37, %v3335_v62  ;;  %v2584_v37 = vpack.c.bf16 %v139_v44, %v135_v21  ;;  %v156_v44 = vld [vmem:[#allocation8 + $0x100] sm:$0xff] }
 0x34e   :  { %v1287_v55 = vsel %vm992_vm0, %v1255_v25, %v1251_v48  ;;  %v136_v48 = vld [vmem:[#allocation8 + $0x60] sm:$0xff]  ;;  %v134_v25 = vld [vmem:[#allocation8 + $0x50] sm:$0xff] }
 0x34f   :  { %v1288_v57 = vsel %vm994_vm1, %v1259_v43, %v1287_v55  ;;  %v1206_v59 = vpop.permute.xlu1 %1205  ;;  %v2522_v43 = vpack.c.bf16 %v136_v48, %v132_v47  ;;  %v141_v55 = vld [vmem:[#allocation8 + $0x88] sm:$0xff]  ;;  %v162_v48 = vld [vmem:[#allocation8 + $0x130] sm:$0xff] }
 0x350   :  { %v1267_v32 = vrot.slane %v1206_v59, %v3335_v62  ;;  %v1289_v11 = vsel %vm996_vm2, %v1263_v54, %v1288_v57  ;;  %v138_v54 = vld [vmem:[#allocation8 + $0x70] sm:$0xff]  ;;  %v145_v57 = vld [vmem:[#allocation8 + $0xa8] sm:$0xff] }
 0x351   :  { %v2586_v59 = vpack.c.bf16 %v138_v54, %v134_v25  ;;  %2523 = vmatpush1.bf16.msra.mxu0 %v2522_v43  ;;  %v165_v25 = vld [vmem:[#allocation8 + $0x148] sm:$0xff]  ;;  %v167_v54 = vld [vmem:[#allocation8 + $0x158] sm:$0xff] }
 0x352   :  { %v1290_v63 = vsel %vm998_vm3, %v1267_v32, %v1289_v11  ;;  %v2524_v32 = vpack.c.bf16 %v145_v57, %v141_v55  ;;  %v143_v11 = vld [vmem:[#allocation8 + $0x98] sm:$0xff]  ;;  %v169_v43 = vld [vmem:[#allocation8 + $0x168] sm:$0xff]  ;;  %v2534_v57 = vpack.c.bf16 %v160_v45, %v156_v44  ;;  %v182_v44 = vld [vmem:[#allocation8 + $0x1d0] sm:$0xff] }
 0x353   :  { %v1212_v17 = vpop.permute.xlu1 %1211  ;;  %v1291_v22 = vsel %vm1000_vm4, %v1271_v15, %v1290_v63  ;;  %v140_v63 = vld [vmem:[#allocation8 + $0x80] sm:$0xff]  ;;  %v2588_v15 = vpack.c.bf16 %v147_v12, %v143_v11  ;;  %v171_v55 = vld [vmem:[#allocation8 + $0x178] sm:$0xff] }
 0x354   :  { %v1275_v20 = vrot.slane %v1212_v17, %v3335_v62  ;;  %v130_v62 = vld [vmem:[#allocation8 + $0x30] sm:$0xff]  ;;  %v144_v17 = vld [vmem:[#allocation8 + $0xa0] sm:$0xff]  ;;  %2525 = vmatprep.subr.bf16.mxu0 %v2524_v32  ;;  %v2536_v32 = vpack.c.bf16 %v169_v43, %v165_v25  ;;  %v191_v25 = vld [vmem:[#allocation8 + $0x218] sm:$0xff] }
 0x355   :  { %v2582_v8 = vpack.c.bf16 %v130_v62, %v126_v38  ;;  %v161_v38 = vld [vmem:[#allocation8 + $0x128] sm:$0xff]  ;;  %v159_v62 = vld [vmem:[#allocation8 + $0x118] sm:$0xff]  ;;  %v164_v11 = vld [vmem:[#allocation8 + $0x140] sm:$0xff] }
 0x356   :  { %v1292_v23 = vsel %vm1002_vm5, %v1275_v20, %v1291_v22  ;;  %v142_v20 = vld [vmem:[#allocation8 + $0x90] sm:$0xff]  ;;  %v2526_v22 = vpack.c.bf16 %v144_v17, %v140_v63  ;;  %v2532_v21 = vpack.c.bf16 %v161_v38, %v157_v16  ;;  %v2596_v47 = vpack.c.bf16 %v163_v39, %v159_v62  ;;  %v168_v12 = vld [vmem:[#allocation8 + $0x160] sm:$0xff]  ;;  %v183_v16 = vld [vmem:[#allocation8 + $0x1d8] sm:$0xff] }
 0x357   :  { %v1293_v10 = vsel %vm1004_vm6, %v1279_v5, %v1292_v23  ;;  %2583 = vmatpush1.bf16.msra.mxu1 %v2582_v8  ;;  %v146_v5 = vld [vmem:[#allocation8 + $0xb0] sm:$0xff]  ;;  %v149_v23 = vld [vmem:[#allocation8 + $0xc8] sm:$0xff]  ;;  %v2530_v8 = vpack.c.bf16 %v152_v33, %v148_v31  ;;  %v187_v38 = vld [vmem:[#allocation8 + $0x1f8] sm:$0xff] }
 0x358   :  { %v1299_v27 = vsel %vm1015_vm7, %v1293_v10, 0.0  ;;  %2585 = vmatprep.subr.bf16.mxu1 %v2584_v37  ;;  %v153_v10 = vld [vmem:[#allocation8 + $0xe8] sm:$0xff]  ;;  %v2590_v28 = vpack.c.bf16 %v146_v5, %v142_v20  ;;  %2527 = vmatpush1.bf16.msra.mxu0 %v2526_v22  ;;  %v158_v37 = vld [vmem:[#allocation8 + $0x110] sm:$0xff]  ;;  %v175_v22 = vld [vmem:[#allocation8 + $0x198] sm:$0xff]  ;;  %v2608_v45 = vpack.c.bf16 %v187_v38, %v183_v16 }
 0x359   :  { %1300 = vadd.xlane.f32.xlu0 %v1299_v27  ;;  %v151_v27 = vld [vmem:[#allocation8 + $0xd8] sm:$0xff]  ;;  %v2528_v29 = vpack.c.bf16 %v153_v10, %v149_v23  ;;  %v166_v63 = vld [vmem:[#allocation8 + $0x150] sm:$0xff]  ;;  %v173_v20 = vld [vmem:[#allocation8 + $0x188] sm:$0xff]  ;;  %v2538_v10 = vpack.c.bf16 %v168_v12, %v164_v11 }
 0x35a   :  { %v2592_v35 = vpack.c.bf16 %v155_v13, %v151_v27  ;;  %v170_v17 = vld [vmem:[#allocation8 + $0x170] sm:$0xff]  ;;  %v177_v5 = vld [vmem:[#allocation8 + $0x1a8] sm:$0xff]  ;;  %v179_v23 = vld [vmem:[#allocation8 + $0x1b8] sm:$0xff] }
 0x35b   :  { %2587 = vmatpush1.bf16.msra.mxu1 %v2586_v59  ;;  %2529 = vmatprep.subr.bf16.mxu0 %v2528_v29  ;;  %v2598_v59 = vpack.c.bf16 %v162_v48, %v158_v37  ;;  %v2602_v27 = vpack.c.bf16 %v170_v17, %v166_v63  ;;  %v172_v29 = vld [vmem:[#allocation8 + $0x180] sm:$0xff]  ;;  %v174_v31 = vld [vmem:[#allocation8 + $0x190] sm:$0xff]  ;;  %v2604_v33 = vpack.c.bf16 %v179_v23, %v175_v22  ;;  %v193_v48 = vld [vmem:[#allocation8 + $0x228] sm:$0xff] }
 0x35c   :  { %2589 = vmatprep.subr.bf16.mxu1 %v2588_v15  ;;  %2531 = vmatpush1.bf16.msra.mxu0 %v2530_v8  ;;  %v2600_v15 = vpack.c.bf16 %v171_v55, %v167_v54  ;;  %v176_v13 = vld [vmem:[#allocation8 + $0x1a0] sm:$0xff]  ;;  %v2544_v8 = vpack.c.bf16 %v185_v36, %v181_v30  ;;  %v186_v37 = vld [vmem:[#allocation8 + $0x1f0] sm:$0xff]  ;;  %v195_v43 = vld [vmem:[#allocation8 + $0x238] sm:$0xff] }
 0x35d   :  { %2533 = vmatprep.subr.bf16.mxu0 %v2532_v21  ;;  %v2542_v62 = vpack.c.bf16 %v176_v13, %v172_v29  ;;  %v184_v21 = vld [vmem:[#allocation8 + $0x1e0] sm:$0xff]  ;;  %v2610_v55 = vpack.c.bf16 %v186_v37, %v182_v44 }
 0x35e   :  { %v188_v38 = vld [vmem:[#allocation8 + $0x200] sm:$0xff] }
 0x35f   :  { %2591 = vmatpush1.bf16.msra.mxu1 %v2590_v28  ;;  %v2540_v28 = vpack.c.bf16 %v177_v5, %v173_v20 }
 0x360   :  { %2593 = vmatprep.subr.bf16.mxu1 %v2592_v35  ;;  %2535 = vmatpush1.bf16.msra.mxu0 %v2534_v57  ;;  %v178_v35 = vld [vmem:[#allocation8 + $0x1b0] sm:$0xff] }
 0x361   :  { %2537 = vmatprep.subr.bf16.mxu0 %v2536_v32  ;;  %v2606_v39 = vpack.c.bf16 %v178_v35, %v174_v31 }
 0x363   :  { %2595 = vmatpush1.bf16.msra.mxu1 %v2594_v42  ;;  %v180_v42 = vld [vmem:[#allocation8 + $0x1c0] sm:$0xff] }
 0x364   :  { %2597 = vmatprep.subr.bf16.mxu1 %v2596_v47  ;;  %2539 = vmatpush1.bf16.msra.mxu0 %v2538_v10  ;;  %v189_v47 = vld [vmem:[#allocation8 + $0x208] sm:$0xff]  ;;  %v2546_v54 = vpack.c.bf16 %v184_v21, %v180_v42  ;;  %v194_v42 = vld [vmem:[#allocation8 + $0x230] sm:$0xff] }
 0x365   :  { %2541 = vmatprep.subr.bf16.mxu0 %v2540_v28  ;;  %v2548_v57 = vpack.c.bf16 %v193_v48, %v189_v47  ;;  %v197_v47 = vld [vmem:[#allocation8 + $0x248] sm:$0xff] }
 0x366   :  { %v201_v48 = vld [vmem:[#allocation8 + $0x268] sm:$0xff] }
 0x367   :  { %2599 = vmatpush1.bf16.msra.mxu1 %v2598_v59  ;;  %v2612_v59 = vpack.c.bf16 %v195_v43, %v191_v25  ;;  %v199_v25 = vld [vmem:[#allocation8 + $0x258] sm:$0xff]  ;;  %v2552_v43 = vpack.c.bf16 %v201_v48, %v197_v47 }
 0x368   :  { %2601 = vmatprep.subr.bf16.mxu1 %v2600_v15  ;;  %2543 = vmatpush1.bf16.msra.mxu0 %v2542_v62  ;;  %v192_v62 = vld [vmem:[#allocation8 + $0x220] sm:$0xff]  ;;  %v223_v47 = vld [vmem:[#allocation8 + $0x318] sm:$0xff] }
 0x369   :  { %2545 = vmatprep.subr.bf16.mxu0 %v2544_v8  ;;  %v2550_v8 = vpack.c.bf16 %v192_v62, %v188_v38 }
 0x36b   :  { %2603 = vmatpush1.bf16.msra.mxu1 %v2602_v27 }
 0x36c   :  { %2605 = vmatprep.subr.bf16.mxu1 %v2604_v33  ;;  %2547 = vmatpush1.bf16.msra.mxu0 %v2546_v54  ;;  %v196_v54 = vld [vmem:[#allocation8 + $0x240] sm:$0xff] }
 0x36d   :  { %2549 = vmatprep.subr.bf16.mxu0 %v2548_v57 }
 0x36f   :  { %2607 = vmatpush1.bf16.msra.mxu1 %v2606_v39  ;;  %v190_v39 = vld [vmem:[#allocation8 + $0x210] sm:$0xff] }
 0x370   :  { %2609 = vmatprep.subr.bf16.mxu1 %v2608_v45  ;;  %2551 = vmatpush1.bf16.msra.mxu0 %v2550_v8 }
 0x371   :  { %2553 = vmatprep.subr.bf16.mxu0 %v2552_v43  ;;  %v227_v43 = vld [vmem:[#allocation8 + $0x338] sm:$0xff] }
 0x373   :  { %2611 = vmatpush1.bf16.msra.mxu1 %v2610_v55  ;;  %v200_v55 = vld [vmem:[#allocation8 + $0x260] sm:$0xff] }
 0x374   :  { %2613 = vmatprep.subr.bf16.mxu1 %v2612_v59  ;;  %v2554_v59 = vpack.c.bf16 %v200_v55, %v196_v54  ;;  %v224_v54 = vld [vmem:[#allocation8 + $0x320] sm:$0xff] }
 0x376   :  { %2555 = vmatpush1.bf16.msra.mxu0 %v2554_v59 }
 0x3d5   :  { %v1298_v32 = vpop.xlane.xlu1 %1297 }
 0x3d6   :  { %v1311_v11 = vrot.slane %v1298_v32, %v3413_v49  ;;  %v1307_v12 = vrot.slane %v1298_v32, %v3282_v18  ;;  %v1315_v63 = vrot.slane %v1298_v32, %v3416_v50  ;;  %v1319_v15 = vrot.slane %v1298_v32, %v3419_v51 }
 0x3d7   :  { %v1323_v17 = vrot.slane %v1298_v32, %v3427_v58  ;;  %v1327_v20 = vrot.slane %v1298_v32, %v3432_v3  ;;  %v1331_v5 = vrot.slane %v1298_v32, %v3437_v0  ;;  %v1335_v23 = vrot.slane %v1298_v32, %v3442_v14  ;;  %v198_v32 = vld [vmem:[#allocation8 + $0x250] sm:$0xff] }
 0x3d8   :  { %2851 = vrcp.f32 %v1311_v11  ;;  %v202_v11 = vld [vmem:[#allocation8 + $0x270] sm:$0xff] }
 0x3d9   :  { %2853 = vrcp.f32 %v1307_v12 }
 0x3da   :  { %2855 = vrcp.f32 %v1315_v63  ;;  %v2618_v63 = vpack.c.bf16 %v202_v11, %v198_v32 }
 0x3db   :  { %2857 = vrcp.f32 %v1319_v15 }
 0x3dc   :  { %2859 = vrcp.f32 %v1323_v17  ;;  %v205_v17 = vld [vmem:[#allocation8 + $0x288] sm:$0xff] }
 0x3dd   :  { %2861 = vrcp.f32 %v1327_v20  ;;  %v209_v20 = vld [vmem:[#allocation8 + $0x2a8] sm:$0xff] }
 0x3de   :  { %2863 = vrcp.f32 %v1331_v5  ;;  %v207_v5 = vld [vmem:[#allocation8 + $0x298] sm:$0xff] }
 0x3df   :  { %2865 = vrcp.f32 %v1335_v23  ;;  %v204_v23 = vld [vmem:[#allocation8 + $0x280] sm:$0xff] }
 0x3e2   :  { %v2852_v22 = vpop.eup %2851 }
 0x3e3   :  { %v2854_v10 = vpop.eup %2853  ;;  %v1387_v27 = vmul.f32 %v2852_v22, %v3450_v26  ;;  %v211_v22 = vld [vmem:[#allocation8 + $0x2b8] sm:$0xff] }
 0x3e4   :  { %v2856_v28 = vpop.eup %2855  ;;  %v1385_v29 = vmul.f32 %v2854_v10, %v3448_v24  ;;  %v208_v10 = vld [vmem:[#allocation8 + $0x2a0] sm:$0xff] }
 0x3e5   :  { %v2858_v13 = vpop.eup %2857  ;;  %1423 = vperm.xlu1 %2786, %v1387_v27   ;;  %v1389_v33 = vmul.f32 %v2856_v28, %v3458_v34  ;;  %v2558_v27 = vpack.c.bf16 %v208_v10, %v204_v23  ;;  %v206_v28 = vld [vmem:[#allocation8 + $0x290] sm:$0xff] }
 0x3e6   :  { %1418 = vperm.xlu0 %2785, %v1385_v29   ;;  %v3554_v31 = vpop.xlane.xlu0 %1300  ;;  %v2860_v36 = vpop.eup %2859  ;;  %v1391_v24 = vmul.f32 %v2858_v13, %v3465_v41  ;;  %v2614_v41 = vpack.c.bf16 %v194_v42, %v190_v39  ;;  %v210_v29 = vld [vmem:[#allocation8 + $0x2b0] sm:$0xff]  ;;  %v219_v39 = vld [vmem:[#allocation8 + $0x2f8] sm:$0xff] }
 0x3e7   :  { %v1343_v35 = vrot.slane %v3554_v31, %v3413_v49  ;;  %v1339_v30 = vrot.slane %v3554_v31, %v3282_v18  ;;  %v1347_v26 = vrot.slane %v3554_v31, %v3416_v50  ;;  %v2862_v16 = vpop.eup %2861  ;;  %v1355_v34 = vrot.slane %v3554_v31, %v3427_v58  ;;  %v203_v58 = vld [vmem:[#allocation8 + $0x278] sm:$0xff]  ;;  %v218_v42 = vld [vmem:[#allocation8 + $0x2f0] sm:$0xff] }
 0x3e8   :  { %v1393_v21 = vmul.f32 %v2860_v36, %v3471_v46  ;;  %v1351_v44 = vrot.slane %v3554_v31, %v3419_v51  ;;  %v2864_v45 = vpop.eup %2863  ;;  %v1395_v37 = vmul.f32 %v2862_v16, %v3476_v52  ;;  %2615 = vmatpush1.bf16.msra.mxu1 %v2614_v41  ;;  %v1363_v46 = vrot.slane %v3554_v31, %v3437_v0  ;;  %v213_v36 = vld [vmem:[#allocation8 + $0x2c8] sm:$0xff]  ;;  %v215_v16 = vld [vmem:[#allocation8 + $0x2d8] sm:$0xff]  ;;  %v230_v23 = vld [vmem:[#allocation8 + $0x350] sm:$0xff] }
 0x3e9   :  { %1428 = vperm.xlu1 %2786, %v1389_v33   ;;  %2867 = vrcp.f32 %v1343_v35  ;;  %v2616_v57 = vpack.c.bf16 %v203_v58, %v199_v25  ;;  %v1397_v52 = vmul.f32 %v2864_v45, %v3484_v56  ;;  %v1359_v12 = vrot.slane %v3554_v31, %v3432_v3  ;;  %v2866_v15 = vpop.eup %2865  ;;  %v221_v45 = vld [vmem:[#allocation8 + $0x308] sm:$0xff]  ;;  %v220_v58 = vld [vmem:[#allocation8 + $0x300] sm:$0xff]  ;;  %v234_v10 = vld [vmem:[#allocation8 + $0x370] sm:$0xff] }
 0x3ea   :  { %1433 = vperm.xlu0 %2785, %v1391_v24   ;;  %2869 = vrcp.f32 %v1339_v30  ;;  %v2556_v0 = vpack.c.bf16 %v209_v20, %v205_v17  ;;  %v2620_v56 = vpack.c.bf16 %v211_v22, %v207_v5  ;;  %v1399_v13 = vmul.f32 %v2866_v15, %v3491_v1  ;;  %v217_v24 = vld [vmem:[#allocation8 + $0x2e8] sm:$0xff]  ;;  %v212_v1 = vld [vmem:[#allocation8 + $0x2c0] sm:$0xff]  ;;  %v235_v20 = vld [vmem:[#allocation8 + $0x378] sm:$0xff] }
 0x3eb   :  { %2871 = vrcp.f32 %v1347_v26  ;;  %2617 = vmatprep.subr.bf16.mxu1 %v2616_v57  ;;  %v1367_v33 = vrot.slane %v3554_v31, %v3442_v14  ;;  %v2622_v35 = vpack.c.bf16 %v210_v29, %v206_v28  ;;  %v2560_v62 = vpack.c.bf16 %v217_v24, %v213_v36  ;;  %v214_v31 = vld [vmem:[#allocation8 + $0x2d0] sm:$0xff]  ;;  %v228_v5 = vld [vmem:[#allocation8 + $0x340] sm:$0xff]  ;;  %v237_v28 = vld [vmem:[#allocation8 + $0x388] sm:$0xff] }
 0x3ec   :  { %2873 = vrcp.f32 %v1355_v34  ;;  %2619 = vmatpush1.bf16.msra.mxu1 %v2618_v63  ;;  %2557 = vmatprep.subr.bf16.mxu0 %v2556_v0  ;;  %v216_v34 = vld [vmem:[#allocation8 + $0x2e0] sm:$0xff]  ;;  %v2624_v8 = vpack.c.bf16 %v219_v39, %v215_v16  ;;  %v2566_v55 = vpack.c.bf16 %v224_v54, %v220_v58  ;;  %v226_v57 = vld [vmem:[#allocation8 + $0x330] sm:$0xff]  ;;  %v231_v63 = vld [vmem:[#allocation8 + $0x358] sm:$0xff] }
 0x3ed   :  { %1438 = vperm.xlu1 %2786, %v1393_v21   ;;  %2875 = vrcp.f32 %v1351_v44  ;;  %2621 = vmatprep.subr.bf16.mxu1 %v2620_v56  ;;  %v2562_v14 = vpack.c.bf16 %v216_v34, %v212_v1  ;;  %v232_v0 = vld [vmem:[#allocation8 + $0x360] sm:$0xff]  ;;  %v2632_v22 = vpack.c.bf16 %v235_v20, %v231_v63  ;;  %v241_v29 = vld [vmem:[#allocation8 + $0x3a8] sm:$0xff]  ;;  %v242_v16 = vld [vmem:[#allocation8 + $0x3b0] sm:$0xff] }
 0x3ee   :  { %1443 = vperm.xlu0 %2785, %v1395_v37   ;;  %2877 = vrcp.f32 %v1363_v46  ;;  %2559 = vmatpush1.bf16.msra.mxu0 %v2558_v27  ;;  %v225_v37 = vld [vmem:[#allocation8 + $0x328] sm:$0xff]  ;;  %v222_v46 = vld [vmem:[#allocation8 + $0x310] sm:$0xff]  ;;  %v247_v34 = vld [vmem:[#allocation8 + $0x3d8] sm:$0xff] }
 0x3ef   :  { %2879 = vrcp.f32 %v1359_v12  ;;  %2561 = vmatprep.subr.bf16.mxu0 %v2560_v62  ;;  %v2564_v25 = vpack.c.bf16 %v225_v37, %v221_v45  ;;  %v233_v12 = vld [vmem:[#allocation8 + $0x368] sm:$0xff]  ;;  %v98_v37 = vld [vmem:[#allocation2] sm:$0xff]  ;;  %v259_v58 = vld [vmem:[#allocation8 + $0x438] sm:$0xff] }
 0x3f0   :  { %2623 = vmatpush1.bf16.msra.mxu1 %v2622_v35  ;;  %2881 = vrcp.f32 %v1367_v33  ;;  %v2572_v33 = vpack.c.bf16 %v241_v29, %v237_v28  ;;  %v243_v35 = vld [vmem:[#allocation8 + $0x3b8] sm:$0xff]  ;;  %v245_v39 = vld [vmem:[#allocation8 + $0x3c8] sm:$0xff]  ;;  %1743 = vmatprep.mubr.f32.mxu0 %v98_v37 }
 0x3f1   :  { %1448 = vperm.xlu1 %2786, %v1397_v52   ;;  %2625 = vmatprep.subr.bf16.mxu1 %v2624_v8  ;;  %v229_v52 = vld [vmem:[#allocation8 + $0x348] sm:$0xff] }
 0x3f2   :  { %2563 = vmatpush1.bf16.msra.mxu0 %v2562_v14  ;;  %v2568_v17 = vpack.c.bf16 %v233_v12, %v229_v52  ;;  %v249_v1 = vld [vmem:[#allocation8 + $0x3e8] sm:$0xff]  ;;  %v251_v14 = vld [vmem:[#allocation8 + $0x3f8] sm:$0xff]  ;;  %1820 = vmatprep.mubr.f32.mxu1 %v98_v37 }
 0x3f3   :  { %v2868_v3 = vpop.eup %2867  ;;  %2565 = vmatprep.subr.bf16.mxu0 %v2564_v25  ;;  %v2576_v8 = vpack.c.bf16 %v249_v1, %v245_v39  ;;  %v255_v25 = vld [vmem:[#allocation8 + $0x418] sm:$0xff]  ;;  %v2952_v1 = vld [vmem:[#allocation7 + $0x28] sm:$0xff] }
 0x3f4   :  { %v2870_v30 = vpop.eup %2869  ;;  %v1403_v26 = vmul.f32 %v2868_v3, %v3503_v40  ;;  %v2626_v40 = vpack.c.bf16 %v218_v42, %v214_v31  ;;  %v239_v3 = vld [vmem:[#allocation8 + $0x398] sm:$0xff]  ;;  %v244_v31 = vld [vmem:[#allocation8 + $0x3c0] sm:$0xff]  ;;  %v2708_v54 = vpack.c.bf16 %v259_v58, %v255_v25 }
 0x3f5   :  { %v2872_v38 = vpop.eup %2871  ;;  %1453 = vperm.xlu1 %2786, %v1399_v13   ;;  %v1401_v21 = vmul.f32 %v2870_v30, %v3497_v4  ;;  %v2628_v4 = vpack.c.bf16 %v227_v43, %v223_v47  ;;  %v236_v30 = vld [vmem:[#allocation8 + $0x380] sm:$0xff]  ;;  %v2636_v36 = vpack.c.bf16 %v243_v35, %v239_v3  ;;  %v253_v47 = vld [vmem:[#allocation8 + $0x408] sm:$0xff] }
 0x3f6   :  { %1463 = vperm.xlu0 %2785, %v1403_v26   ;;  %v2874_v44 = vpop.eup %2873  ;;  %v1405_v41 = vmul.f32 %v2872_v38, %v3478_v53  ;;  %2627 = vmatpush1.bf16.msra.mxu1 %v2626_v40  ;;  %v2630_v53 = vpack.c.bf16 %v226_v57, %v222_v46  ;;  %v240_v26 = vld [vmem:[#allocation8 + $0x3a0] sm:$0xff]  ;;  %v2947_v57 = vld [vmem:[#allocation7 + $0x8] sm:$0xff] }
 0x3f7   :  { %v2876_v48 = vpop.eup %2875  ;;  %v1409_v59 = vmul.f32 %v2874_v44, %v3506_v9  ;;  %2629 = vmatprep.subr.bf16.mxu1 %v2628_v4  ;;  %2567 = vmatpush1.bf16.msra.mxu0 %v2566_v55  ;;  %v2570_v9 = vpack.c.bf16 %v232_v0, %v228_v5  ;;  %v2574_v24 = vpack.c.bf16 %v240_v26, %v236_v30  ;;  %v248_v42 = vld [vmem:[#allocation8 + $0x3e0] sm:$0xff]  ;;  %v246_v44 = vld [vmem:[#allocation8 + $0x3d0] sm:$0xff]  ;;  %v2167_v4 = vadd.s32 4294967295, %v3329_v60 }
 0x3f8   :  { %v2878_v32 = vpop.eup %2877  ;;  %v1407_v11 = vmul.f32 %v2876_v48, %v3486_v19  ;;  %2569 = vmatprep.subr.bf16.mxu0 %v2568_v17  ;;  %v2634_v19 = vpack.c.bf16 %v234_v10, %v230_v23  ;;  %v2578_v40 = vpack.c.bf16 %v248_v42, %v244_v31  ;;  %v257_v48 = vld [vmem:[#allocation8 + $0x428] sm:$0xff]  ;;  %v2949_v60 = vld [vmem:[#allocation7 + $0x10] sm:$0xff]  ;;  %v3602_v23 = vld [vmem:[#allocation8 + $0x420] sm:$0xff] }
 0x3f9   :  { %1458 = vperm.xlu1 %2786, %v1401_v21   ;;  %v2880_v15 = vpop.eup %2879  ;;  %v1413_v56 = vmul.f32 %v2878_v32, %v3509_v61  ;;  %v96_v61 = vld [vmem:[%s3746_s0] sm:$0xff]  ;;  %v2640_v21 = vpack.c.bf16 %v251_v14, %v247_v34  ;;  %v2644_v43 = vpack.c.bf16 %v257_v48, %v253_v47  ;;  %v3594_v55 = vsub.s32 %v2167_v4, %v3274_v6  ;;  %v3611_v14 = vld [vmem:[#allocation8 + $0x410] sm:$0xff] }
 0x3fa   :  { %1468 = vperm.xlu0 %2785, %v1405_v41   ;;  %2631 = vmatpush1.bf16.msra.mxu1 %v2630_v53  ;;  %v1411_v27 = vmul.f32 %v2880_v15, %v3493_v2  ;;  %v2882_v13 = vpop.eup %2881  ;;  %v238_v2 = vld [vmem:[#allocation8 + $0x390] sm:$0xff] }
 0x3fb   :  { %2633 = vmatprep.subr.bf16.mxu1 %v2632_v22  ;;  %2571 = vmatpush1.bf16.msra.mxu0 %v2570_v9  ;;  %v2638_v38 = vpack.c.bf16 %v242_v16, %v238_v2  ;;  %v1415_v62 = vmul.f32 %v2882_v13, %v3499_v7  ;;  %v250_v41 = vld [vmem:[#allocation8 + $0x3f0] sm:$0xff]  ;;  %v97_v7 = vld [vmem:[%s3746_s0 + $0x8] sm:$0xff]  ;;  %v3600_v9 = vld [vmem:[#allocation8 + $0x400] sm:$0xff]  ;;  %s3140_s0 = smov [#allocation11]  }
 0x3fc   :  { %2573 = vmatprep.subr.bf16.mxu0 %v2572_v33  ;;  %v2642_v45 = vpack.c.bf16 %v250_v41, %v246_v44  ;;  %v2646_v26 = vpack.c.bf16 %v3602_v23, %v3600_v9  ;;  %v3613_v31 = vld [vmem:[#allocation8 + $0x430] sm:$0xff]  ;;  %v3616_v41 = vld [vmem:[#allocation8 + $0x448] sm:$0xff]  ;;  %s2261_s26 = sshll.u32 %s3140_s0, 4  ;;  %s2262_s26 = int_to_ptr.vmem [resolvable:$true] %s2261_s26 }
 0x3fd   :  { %1478 = vperm.xlu1 %2786, %v1409_v59   ;;  %v270_v9 = vld [vmem:[#allocation8 + $0x490] sm:$0xff]  ;;  %s3075_s2 = scalar_lea.vmem %s2262_s26, 512  ;;  %p3080_p13 = scmp.lt.s32.totalorder %s2262_s26, %s2262_s26 }
 0x3fe   :  { %1473 = vperm.xlu0 %2785, %v1407_v11   ;;  %2635 = vmatpush1.bf16.msra.mxu1 %v2634_v19  ;;  %v2948_v11 = vld [vmem:[#allocation7] sm:$0xff]  ;;  %v274_v23 = vld [vmem:[#allocation8 + $0x4b0] sm:$0xff]  ;;  %p3076_p12 = scmp.ne.s32.totalorder %s2262_s26, %s3075_s2  ;;  %p3081_p0 = scmp.lt.s32.totalorder %s3075_s2, %s3075_s2 }
 0x3ff   :  { %2637 = vmatprep.subr.bf16.mxu1 %v2636_v36  ;;  %2575 = vmatpush1.bf16.msra.mxu0 %v2574_v24  ;;  %v2951_v24 = vld [vmem:[#allocation7 + $0x20] sm:$0xff] }
 0x400   :  { %2577 = vmatprep.subr.bf16.mxu0 %v2576_v8  ;;  %p3082_p1 = por %p3081_p0, %p3080_p13 }
 0x401   :  { %1488 = vperm.xlu1 %2786, %v1413_v56   ;;  %v2950_v56 = vld [vmem:[#allocation7 + $0x18] sm:$0xff] }
 0x402   :  { %1483 = vperm.xlu0 %2785, %v1411_v27   ;;  %2639 = vmatpush1.bf16.msra.mxu1 %v2638_v38  ;;  %p3083_p2 = pnand %p3082_p1, %p3076_p12 }
 0x403   :  { %2641 = vmatprep.subr.bf16.mxu1 %v2640_v21  ;;  %2579 = vmatpush1.bf16.msra.mxu0 %v2578_v40 }
 0x404   :  { %2645 = vmatprep.subr.bf16.mxu0 %v2644_v43 }
 0x405   :  { %1642 = vperm.xlu1 %2786, %v96_v61  }
 0x406   :  { %1493 = vperm.xlu0 %2785, %v1415_v62   ;;  %2643 = vmatpush1.bf16.msra.mxu1 %v2642_v45 }
 0x407   :  { %2709 = vmatprep.subr.bf16.mxu1 %v2708_v54  ;;  %v2953_v54 = vld [vmem:[#allocation7 + $0x30] sm:$0xff] }
 0x40a   :  { %1647 = vperm.xlu0 %2785, %v97_v7   ;;  %v3618_v7 = vld [vmem:[#allocation8 + $0x468] sm:$0xff] }
 0x464   :  { %v1424_v46 = vpop.permute.xlu1 %1423 }
 0x465   :  { %v1497_v59 = vmul.f32 %v2947_v57, %v1424_v46  ;;  %v2175_v53 = vrot.slane %v1424_v46, %v3594_v55  ;;  %v1419_v32 = vpop.permute.xlu0 %1418  ;;  %v2710_v46 = vpack.c.bf16 %v3613_v31, %v3611_v14 }
 0x466   :  { %v1496_v52 = vmul.f32 %v2948_v11, %v1419_v32  ;;  %v2171_v12 = vrot.slane %v1419_v32, %v3594_v55  ;;  %v2648_v32 = vpack.c.bf16 %v3618_v7, %v3616_v41 }
 0x467   :  { %v1518_v63 = vrot.slane %v1497_v59, 4 }
 0x468   :  { %v1512_v15 = vrot.slane %v1496_v52, 4  ;;  %v2232_v17 = vsel %vm992_vm0, %v2175_v53, %v2171_v12  ;;  %v1429_v20 = vpop.permute.xlu1 %1428 }
 0x469   :  { %v1519_v5 = vadd.f32 %v1518_v63, %v1497_v59  ;;  %v1498_v0 = vmul.f32 %v2949_v60, %v1429_v20  ;;  %v2179_v6 = vrot.slane %v1429_v20, %v3594_v55  ;;  %v1434_v22 = vpop.permute.xlu0 %1433 }
 0x46a   :  { %v1513_v10 = vadd.f32 %v1512_v15, %v1496_v52  ;;  %v1499_v19 = vmul.f32 %v2950_v56, %v1434_v22  ;;  %v2183_v27 = vrot.slane %v1434_v22, %v3594_v55  ;;  %v3626_v15 = vld [vmem:[#allocation8 + $0x458] sm:$0xff]  ;;  %v3631_v22 = vld [vmem:[#allocation8 + $0x440] sm:$0xff] }
 0x46b   :  { %v1520_v28 = vrot.slane %v1519_v5, 2  ;;  %v1524_v29 = vrot.slane %v1498_v0, 4  ;;  %v2233_v3 = vsel %vm994_vm1, %v2179_v6, %v2232_v17  ;;  %v3628_v17 = vld [vmem:[#allocation8 + $0x478] sm:$0xff] }
 0x46c   :  { %v1514_v13 = vrot.slane %v1513_v10, 2  ;;  %v1530_v33 = vrot.slane %v1499_v19, 4  ;;  %v2234_v35 = vsel %vm996_vm2, %v2183_v27, %v2233_v3  ;;  %v1439_v30 = vpop.permute.xlu1 %1438 }
 0x46d   :  { %v1521_v61 = vadd.f32 %v1520_v28, %v1519_v5  ;;  %v1525_v36 = vadd.f32 %v1524_v29, %v1498_v0  ;;  %v1500_v2 = vmul.f32 %v2951_v24, %v1439_v30  ;;  %v2187_v16 = vrot.slane %v1439_v30, %v3594_v55  ;;  %v1444_v38 = vpop.permute.xlu0 %1443  ;;  %v2954_v28 = vld [vmem:[#allocation7 + $0x38] sm:$0xff] }
 0x46e   :  { %v1515_v62 = vadd.f32 %v1514_v13, %v1513_v10  ;;  %v1531_v39 = vadd.f32 %v1530_v33, %v1499_v19  ;;  %v1501_v34 = vmul.f32 %v2952_v1, %v1444_v38  ;;  %v2191_v8 = vrot.slane %v1444_v38, %v3594_v55  ;;  %v3633_v10 = vld [vmem:[#allocation8 + $0x460] sm:$0xff] }
 0x46f   :  { %v1522_v42 = vrot.slane %v1521_v61, 1  ;;  %v1526_v21 = vrot.slane %v1525_v36, 2  ;;  %v1536_v40 = vrot.slane %v1500_v2, 4  ;;  %v2235_v44 = vsel %vm998_vm3, %v2187_v16, %v2234_v35  ;;  %v2955_v35 = vld [vmem:[#allocation7 + $0x48] sm:$0xff] }
 0x470   :  { %v1516_v45 = vrot.slane %v1515_v62, 1  ;;  %v1532_v37 = vrot.slane %v1531_v39, 2  ;;  %v1542_v47 = vrot.slane %v1501_v34, 4  ;;  %v2236_v48 = vsel %vm1000_vm4, %v2191_v8, %v2235_v44  ;;  %v1449_v25 = vpop.permute.xlu1 %1448 }
 0x471   :  { %v1527_v43 = vadd.f32 %v1526_v21, %v1525_v36  ;;  %v1537_v58 = vadd.f32 %v1536_v40, %v1500_v2  ;;  %v1502_v4 = vmul.f32 %v2953_v54, %v1449_v25  ;;  %v2195_v53 = vrot.slane %v1449_v25, %v3594_v55  ;;  %v2957_v54 = vld [vmem:[#allocation7 + $0x50] sm:$0xff] }
 0x472   :  { %v1533_v57 = vadd.f32 %v1532_v37, %v1531_v39  ;;  %v1543_v59 = vadd.f32 %v1542_v47, %v1501_v34  ;;  %v1523_v11 = vadd.f32 %v1522_v42, %v1521_v61  ;;  %v1517_v20 = vadd.f32 %v1516_v45, %v1515_v62  ;;  %v2956_v47 = vld [vmem:[#allocation7 + $0x40] sm:$0xff] }
 0x473   :  { %v1528_v52 = vrot.slane %v1527_v43, 1  ;;  %v1538_v12 = vrot.slane %v1537_v58, 2  ;;  %v1548_v63 = vrot.slane %v1502_v4, 4  ;;  %v2237_v0 = vsel %vm1002_vm5, %v2195_v53, %v2236_v48 }
 0x474   :  { %v1534_v5 = vrot.slane %v1533_v57, 1  ;;  %v1544_v60 = vrot.slane %v1543_v59, 2  ;;  %v1454_v6 = vpop.permute.xlu1 %1453  ;;  %v2712_v61 = vpack.c.bf16 %v3628_v17, %v3626_v15  ;;  %v2650_v16 = vpack.c.bf16 %v3633_v10, %v3631_v22  ;;  %v276_v17 = vld [vmem:[#allocation8 + $0x4c0] sm:$0xff] }
 0x475   :  { %v1529_v56 = vadd.f32 %v1528_v52, %v1527_v43  ;;  %v1539_v19 = vadd.f32 %v1538_v12, %v1537_v58  ;;  %v1549_v27 = vadd.f32 %v1548_v63, %v1502_v4  ;;  %v1503_v29 = vmul.f32 %v2954_v28, %v1454_v6  ;;  %v1464_v3 = vpop.permute.xlu0 %1463 }
 0x476   :  { %v1545_v13 = vadd.f32 %v1544_v60, %v1543_v59  ;;  %v2199_v33 = vrot.slane %v1454_v6, %v3594_v55  ;;  %v1505_v30 = vmul.f32 %v2955_v35, %v1464_v3  ;;  %v1624_v38 = vsel %vm992_vm0, %v1523_v11, %v1517_v20 }
 0x477   :  { %v1540_v36 = vrot.slane %v1539_v19, 1  ;;  %v1550_v24 = vrot.slane %v1549_v27, 2  ;;  %v1554_v2 = vrot.slane %v1503_v29, 4  ;;  %v1535_v62 = vadd.f32 %v1534_v5, %v1533_v57 }
 0x478   :  { %v3642_v39 = vsel %vm1004_vm6, %v2199_v33, %v2237_v0  ;;  %v1566_v1 = vrot.slane %v1505_v30, 4  ;;  %v1459_v34 = vpop.permute.xlu1 %1458  ;;  %v1625_v8 = vsel %vm994_vm1, %v1529_v56, %v1624_v38  ;;  %v1546_v42 = vrot.slane %v1545_v13, 1  ;;  %v2959_v33 = vld [vmem:[#allocation7 + $0x58] sm:$0xff] }
 0x479   :  { %v1551_v21 = vadd.f32 %v1550_v24, %v1549_v27  ;;  %v1555_v40 = vadd.f32 %v1554_v2, %v1503_v29  ;;  %v1469_v44 = vpop.permute.xlu0 %1468  ;;  %v2207_v37 = vrot.slane %v1464_v3, %v3594_v55  ;;  %v1504_v48 = vmul.f32 %v2956_v47, %v1459_v34  ;;  %v2958_v27 = vld [vmem:[#allocation7 + $0x60] sm:$0xff] }
 0x47a   :  { %v1567_v45 = vadd.f32 %v1566_v1, %v1505_v30  ;;  %v2203_v25 = vrot.slane %v1459_v34, %v3594_v55  ;;  %v1541_v43 = vadd.f32 %v1540_v36, %v1539_v19  ;;  %v1506_v4 = vmul.f32 %v2957_v54, %v1469_v44 }
 0x47b   :  { %v1556_v58 = vrot.slane %v1555_v40, 2  ;;  %v2211_v57 = vrot.slane %v1469_v44, %v3594_v55  ;;  %v1552_v59 = vrot.slane %v1551_v21, 1  ;;  %v1560_v11 = vrot.slane %v1504_v48, 4 }
 0x47c   :  { %v1568_v53 = vrot.slane %v1567_v45, 2  ;;  %v2239_v52 = vsel %vm992_vm0, %v2207_v37, %v2203_v25  ;;  %v1479_v12 = vpop.permute.xlu1 %1478  ;;  %v1626_v63 = vsel %vm996_vm2, %v1535_v62, %v1625_v8  ;;  %v1572_v5 = vrot.slane %v1506_v4, 4  ;;  %v2960_v37 = vld [vmem:[#allocation7 + $0x70] sm:$0xff] }
 0x47d   :  { %v1557_v20 = vadd.f32 %v1556_v58, %v1555_v40  ;;  %v2240_v60 = vsel %vm994_vm1, %v2211_v57, %v2239_v52  ;;  %v1474_v0 = vpop.permute.xlu0 %1473  ;;  %v1547_v6 = vadd.f32 %v1546_v42, %v1545_v13  ;;  %v1561_v19 = vadd.f32 %v1560_v11, %v1504_v48  ;;  %v2961_v57 = vld [vmem:[#allocation7 + $0x68] sm:$0xff] }
 0x47e   :  { %v1569_v56 = vadd.f32 %v1568_v53, %v1567_v45  ;;  %v1508_v28 = vmul.f32 %v2958_v27, %v1479_v12  ;;  %v1573_v3 = vadd.f32 %v1572_v5, %v1506_v4  ;;  %v1507_v35 = vmul.f32 %v2959_v33, %v1474_v0  ;;  %v266_v5 = vld [vmem:[#allocation8 + $0x470] sm:$0xff] }
 0x47f   :  { %v1558_v29 = vrot.slane %v1557_v20, 1  ;;  %v2215_v30 = vrot.slane %v1474_v0, %v3594_v55  ;;  %v1553_v36 = vadd.f32 %v1552_v59, %v1551_v21  ;;  %v1562_v24 = vrot.slane %v1561_v19, 2 }
 0x480   :  { %v1584_v2 = vrot.slane %v1508_v28, 4  ;;  %v1489_v38 = vpop.permute.xlu1 %1488  ;;  %v1627_v62 = vsel %vm998_vm3, %v1541_v43, %v1626_v63  ;;  %v1574_v1 = vrot.slane %v1573_v3, 2  ;;  %v2219_v34 = vrot.slane %v1479_v12, %v3594_v55  ;;  %v262_v63 = vld [vmem:[#allocation8 + $0x450] sm:$0xff] }
 0x481   :  { %v1578_v13 = vrot.slane %v1507_v35, 4  ;;  %v2241_v8 = vsel %vm996_vm2, %v2215_v30, %v2240_v60  ;;  %v1484_v42 = vpop.permute.xlu0 %1483  ;;  %v1570_v40 = vrot.slane %v1569_v56, 1  ;;  %v1563_v44 = vadd.f32 %v1562_v24, %v1561_v19  ;;  %v269_v30 = vld [vmem:[#allocation8 + $0x488] sm:$0xff] }
 0x482   :  { %v1585_v45 = vadd.f32 %v1584_v2, %v1508_v28  ;;  %v1510_v47 = vmul.f32 %v2960_v37, %v1489_v38  ;;  %v1559_v48 = vadd.f32 %v1558_v29, %v1557_v20  ;;  %v1575_v25 = vadd.f32 %v1574_v1, %v1573_v3  ;;  %v99_v28 = vld [vmem:[#allocation2 + $0x8] sm:$0xff]  ;;  %v271_v1 = vld [vmem:[#allocation8 + $0x498] sm:$0xff] }
 0x483   :  { %v1579_v21 = vadd.f32 %v1578_v13, %v1507_v35  ;;  %v2242_v58 = vsel %vm998_vm3, %v2219_v34, %v2241_v8  ;;  %v1564_v54 = vrot.slane %v1563_v44, 1  ;;  %v1509_v59 = vmul.f32 %v2961_v57, %v1484_v42  ;;  %v273_v24 = vld [vmem:[#allocation8 + $0x4a8] sm:$0xff]  ;;  %v275_v34 = vld [vmem:[#allocation8 + $0x4b8] sm:$0xff] }
 0x484   :  { %v1586_v4 = vrot.slane %v1585_v45, 2  ;;  %v1596_v43 = vrot.slane %v1510_v47, 4  ;;  %v2227_v11 = vrot.slane %v1489_v38, %v3594_v55  ;;  %v2223_v52 = vrot.slane %v1484_v42, %v3594_v55  ;;  %v2962_v42 = vld [vmem:[#allocation7 + $0x78] sm:$0xff] }
 0x485   :  { %v1580_v53 = vrot.slane %v1579_v21, 2  ;;  %v1628_v12 = vsel %vm1000_vm4, %v1547_v6, %v1627_v62  ;;  %v1576_v60 = vrot.slane %v1575_v25, 1  ;;  %v1590_v0 = vrot.slane %v1509_v59, 4  ;;  %v1494_v27 = vpop.permute.xlu0 %1493  ;;  %v283_v57 = vld [vmem:[#allocation8 + $0x4f8] sm:$0xff] }
 0x486   :  { %v1597_v20 = vadd.f32 %v1596_v43, %v1510_v47  ;;  %v1629_v19 = vsel %vm1002_vm5, %v1553_v36, %v1628_v12  ;;  %v1565_v29 = vadd.f32 %v1564_v54, %v1563_v44  ;;  %v2243_v33 = vsel %vm1000_vm4, %v2223_v52, %v2242_v58  ;;  %v279_v43 = vld [vmem:[#allocation8 + $0x4d8] sm:$0xff]  ;;  %v280_v12 = vld [vmem:[#allocation8 + $0x4e0] sm:$0xff] }
 0x487   :  { %v1581_v3 = vadd.f32 %v1580_v53, %v1579_v21  ;;  %v1630_v35 = vsel %vm1004_vm6, %v1559_v48, %v1629_v19  ;;  %v1587_v2 = vadd.f32 %v1586_v4, %v1585_v45  ;;  %v1591_v6 = vadd.f32 %v1590_v0, %v1509_v59  ;;  %v272_v45 = vld [vmem:[#allocation8 + $0x4a0] sm:$0xff]  ;;  %v281_v4 = vld [vmem:[#allocation8 + $0x4e8] sm:$0xff] }
 0x488   :  { %v1598_v38 = vrot.slane %v1597_v20, 2  ;;  %1744 = vmatmul.mubr.f32.vlgmr.msra.gmra.mrb[2].mxu0 %v1630_v35  ;;  %1821 = vmatmul.mubr.f32.vlgmr.msra.gmra.mrb[16].mxu1 %v1630_v35  ;;  %v2714_v62 = vpack.c.bf16 %v266_v5, %v262_v63  ;;  %v1571_v13 = vadd.f32 %v1570_v40, %v1569_v56  ;;  %v2244_v8 = vsel %vm1002_vm5, %v2227_v11, %v2243_v33  ;;  %v268_v40 = vld [vmem:[#allocation8 + $0x480] sm:$0xff]  ;;  %v278_v63 = vld [vmem:[#allocation8 + $0x4d0] sm:$0xff] }
 0x489   :  { %v1582_v36 = vrot.slane %v1581_v3, 1  ;;  %v1511_v44 = vmul.f32 %v2962_v42, %v1494_v27  ;;  %1749 = vmatprep.mubr.f32.mxu0 %v99_v28  ;;  %1826 = vmatprep.mubr.f32.mxu1 %v99_v28  ;;  %v1577_v37 = vadd.f32 %v1576_v60, %v1575_v25  ;;  %v1592_v47 = vrot.slane %v1591_v6, 2  ;;  %v282_v5 = vld [vmem:[#allocation8 + $0x4f0] sm:$0xff] }
 0x48a   :  { %v2231_v48 = vrot.slane %v1494_v27, %v3594_v55  ;;  %2647 = vmatpush1.bf16.msra.mxu0 %v2646_v26  ;;  %2711 = vmatpush1.bf16.msra.mxu1 %v2710_v46  ;;  %v2652_v56 = vpack.c.bf16 %v273_v24, %v269_v30  ;;  %v1631_v21 = vsel %vm992_vm0, %v1571_v13, %v1565_v29  ;;  %v277_v26 = vld [vmem:[#allocation8 + $0x4c8] sm:$0xff]  ;;  %v1588_v14 = vrot.slane %v1587_v2, 1  ;;  %v2963_v30 = vld [vmem:[#allocation2 + $0x10] sm:$0xff] }
 0x48b   :  { %v1583_v58 = vadd.f32 %v1582_v36, %v1581_v3  ;;  %v1602_v54 = vrot.slane %v1511_v44, 4  ;;  %2649 = vmatprep.subr.bf16.mxu0 %v2648_v32  ;;  %2713 = vmatprep.subr.bf16.mxu1 %v2712_v61  ;;  %v2716_v55 = vpack.c.bf16 %v275_v34, %v271_v1  ;;  %v1599_v31 = vadd.f32 %v1598_v38, %v1597_v20  ;;  %v285_v24 = vld [vmem:[#allocation8 + $0x508] sm:$0xff]  ;;  %v287_v38 = vld [vmem:[#allocation8 + $0x518] sm:$0xff]  ;;  %v284_v1 = vld [vmem:[#allocation8 + $0x500] sm:$0xff] }
 0x48c   :  { %v1593_v46 = vadd.f32 %v1592_v47, %v1591_v6  ;;  %v3678_v25 = vsel %vm1004_vm6, %v2231_v48, %v2244_v8  ;;  %v1632_v41 = vsel %vm994_vm1, %v1577_v37, %v1631_v21  ;;  %v2654_v32 = vpack.c.bf16 %v272_v45, %v268_v40  ;;  %v288_v34 = vld [vmem:[#allocation8 + $0x520] sm:$0xff]  ;;  %v286_v8 = vld [vmem:[#allocation8 + $0x510] sm:$0xff]  ;;  %v293_v37 = vld [vmem:[#allocation8 + $0x548] sm:$0xff] }
 0x48d   :  { %v1603_v59 = vadd.f32 %v1602_v54, %v1511_v44  ;;  %v2718_v15 = vpack.c.bf16 %v274_v23, %v270_v9  ;;  %v1633_v53 = vsel %vm996_vm2, %v1583_v58, %v1632_v41  ;;  %v2656_v11 = vpack.c.bf16 %v281_v4, %v277_v26  ;;  %v290_v42 = vld [vmem:[#allocation8 + $0x530] sm:$0xff]  ;;  %v297_v47 = vld [vmem:[#allocation8 + $0x568] sm:$0xff]  ;;  %v295_v48 = vld [vmem:[#allocation8 + $0x558] sm:$0xff] }
 0x48e   :  { %v1594_v7 = vrot.slane %v1593_v46, 1  ;;  %2651 = vmatpush1.bf16.msra.mxu0 %v2650_v16  ;;  %2715 = vmatpush1.bf16.msra.mxu1 %v2714_v62  ;;  %v2720_v52 = vpack.c.bf16 %v283_v57, %v279_v43  ;;  %v1589_v60 = vadd.f32 %v1588_v14, %v1587_v2  ;;  %v1600_v20 = vrot.slane %v1599_v31, 1  ;;  %v289_v2 = vld [vmem:[#allocation8 + $0x528] sm:$0xff]  ;;  %v291_v62 = vld [vmem:[#allocation8 + $0x538] sm:$0xff]  ;;  %v292_v45 = vld [vmem:[#allocation8 + $0x540] sm:$0xff] }
 0x48f   :  { %v1604_v61 = vrot.slane %v1603_v59, 2  ;;  %2653 = vmatprep.subr.bf16.mxu0 %v2652_v56  ;;  %2717 = vmatprep.subr.bf16.mxu1 %v2716_v55  ;;  %v2658_v10 = vpack.c.bf16 %v280_v12, %v276_v17  ;;  %v2722_v16 = vpack.c.bf16 %v282_v5, %v278_v63  ;;  %v2660_v6 = vpack.c.bf16 %v289_v2, %v285_v24  ;;  %v299_v40 = vld [vmem:[#allocation8 + $0x578] sm:$0xff]  ;;  %v296_v21 = vld [vmem:[#allocation8 + $0x560] sm:$0xff]  ;;  %v294_v55 = vld [vmem:[#allocation8 + $0x550] sm:$0xff] }
 0x490   :  { %v1595_v0 = vadd.f32 %v1594_v7, %v1593_v46  ;;  %v1634_v22 = vsel %vm998_vm3, %v1589_v60, %v1633_v53  ;;  %v1601_v29 = vadd.f32 %v1600_v20, %v1599_v31  ;;  %v2724_v13 = vpack.c.bf16 %v291_v62, %v287_v38  ;;  %v298_v9 = vld [vmem:[#allocation8 + $0x570] sm:$0xff]  ;;  %v301_v26 = vld [vmem:[#allocation8 + $0x588] sm:$0xff]  ;;  %v303_v31 = vld [vmem:[#allocation8 + $0x598] sm:$0xff] }
 0x491   :  { %v1605_v19 = vadd.f32 %v1604_v61, %v1603_v59  ;;  %v2662_v36 = vpack.c.bf16 %v288_v34, %v284_v1  ;;  %v2726_v44 = vpack.c.bf16 %v290_v42, %v286_v8  ;;  %v2664_v56 = vpack.c.bf16 %v297_v47, %v293_v37  ;;  %v305_v14 = vld [vmem:[#allocation8 + $0x5a8] sm:$0xff]  ;;  %v307_v4 = vld [vmem:[#allocation8 + $0x5b8] sm:$0xff]  ;;  %v300_v43 = vld [vmem:[#allocation8 + $0x580] sm:$0xff] }
 0x492   :  { %2655 = vmatpush1.bf16.msra.mxu0 %v2654_v32  ;;  %2719 = vmatpush1.bf16.msra.mxu1 %v2718_v15  ;;  %v1635_v28 = vsel %vm1000_vm4, %v1595_v0, %v1634_v22  ;;  %v2728_v58 = vpack.c.bf16 %v299_v40, %v295_v48  ;;  %v2666_v54 = vpack.c.bf16 %v296_v21, %v292_v45  ;;  %v304_v57 = vld [vmem:[#allocation8 + $0x5a0] sm:$0xff]  ;;  %v302_v7 = vld [vmem:[#allocation8 + $0x590] sm:$0xff]  ;;  %v309_v17 = vld [vmem:[#allocation8 + $0x5c8] sm:$0xff] }
 0x493   :  { %v1606_v27 = vrot.slane %v1605_v19, 1  ;;  %2657 = vmatprep.subr.bf16.mxu0 %v2656_v11  ;;  %2721 = vmatprep.subr.bf16.mxu1 %v2720_v52  ;;  %v1636_v33 = vsel %vm1002_vm5, %v1601_v29, %v1635_v28  ;;  %v2730_v23 = vpack.c.bf16 %v298_v9, %v294_v55  ;;  %v2668_v46 = vpack.c.bf16 %v305_v14, %v301_v26  ;;  %v306_v32 = vld [vmem:[#allocation8 + $0x5b0] sm:$0xff]  ;;  %v313_v61 = vld [vmem:[#allocation8 + $0x5e8] sm:$0xff]  ;;  %v311_v53 = vld [vmem:[#allocation8 + $0x5d8] sm:$0xff] }
 0x494   :  { %v2732_v59 = vpack.c.bf16 %v307_v4, %v303_v31  ;;  %v2670_v41 = vpack.c.bf16 %v304_v57, %v300_v43  ;;  %v2734_v15 = vpack.c.bf16 %v306_v32, %v302_v7  ;;  %v2672_v11 = vpack.c.bf16 %v313_v61, %v309_v17  ;;  %v315_v52 = vld [vmem:[#allocation8 + $0x5f8] sm:$0xff]  ;;  %v308_v12 = vld [vmem:[#allocation8 + $0x5c0] sm:$0xff]  ;;  %v310_v20 = vld [vmem:[#allocation8 + $0x5d0] sm:$0xff] }
 0x495   :  { %v1607_v3 = vadd.f32 %v1606_v27, %v1605_v19  ;;  %v312_v63 = vld [vmem:[#allocation8 + $0x5e0] sm:$0xff]  ;;  %v2736_v5 = vpack.c.bf16 %v315_v52, %v311_v53  ;;  %v314_v0 = vld [vmem:[#allocation8 + $0x5f0] sm:$0xff]  ;;  %v317_v22 = vld [vmem:[#allocation8 + $0x608] sm:$0xff] }
 0x496   :  { %2659 = vmatpush1.bf16.msra.mxu0 %v2658_v10  ;;  %2723 = vmatpush1.bf16.msra.mxu1 %v2722_v16  ;;  %v2674_v60 = vpack.c.bf16 %v312_v63, %v308_v12  ;;  %v2738_v19 = vpack.c.bf16 %v314_v0, %v310_v20  ;;  %v321_v10 = vld [vmem:[#allocation8 + $0x628] sm:$0xff]  ;;  %v319_v16 = vld [vmem:[#allocation8 + $0x618] sm:$0xff]  ;;  %v316_v29 = vld [vmem:[#allocation8 + $0x600] sm:$0xff] }
 0x497   :  { %v1637_v35 = vsel %vm1004_vm6, %v1607_v3, %v1636_v33  ;;  %2661 = vmatprep.subr.bf16.mxu0 %v2660_v6  ;;  %2725 = vmatprep.subr.bf16.mxu1 %v2724_v13  ;;  %v2676_v27 = vpack.c.bf16 %v321_v10, %v317_v22  ;;  %v323_v28 = vld [vmem:[#allocation8 + $0x638] sm:$0xff]  ;;  %v320_v3 = vld [vmem:[#allocation8 + $0x620] sm:$0xff]  ;;  %v322_v24 = vld [vmem:[#allocation8 + $0x630] sm:$0xff] }
 0x498   :  { %1750 = vmatmul.mubr.f32.gmra.mrb[4].mxu0 %v1637_v35  ;;  %1827 = vmatmul.mubr.f32.gmra.mrb[18].mxu1 %v1637_v35  ;;  %v2740_v33 = vpack.c.bf16 %v323_v28, %v319_v16  ;;  %v2678_v35 = vpack.c.bf16 %v320_v3, %v316_v29  ;;  %v325_v38 = vld [vmem:[#allocation8 + $0x648] sm:$0xff]  ;;  %v327_v62 = vld [vmem:[#allocation8 + $0x658] sm:$0xff]  ;;  %v324_v13 = vld [vmem:[#allocation8 + $0x640] sm:$0xff] }
 0x499   :  { %2003 = vmatprep.mubr.f32.mxu0 %v2963_v30  ;;  %2080 = vmatprep.mubr.f32.mxu1 %v2963_v30  ;;  %v318_v30 = vld [vmem:[#allocation8 + $0x610] sm:$0xff]  ;;  %v329_v6 = vld [vmem:[#allocation8 + $0x668] sm:$0xff]  ;;  %v331_v34 = vld [vmem:[#allocation8 + $0x678] sm:$0xff] }
 0x49a   :  { %2663 = vmatpush1.bf16.msra.mxu0 %v2662_v36  ;;  %2727 = vmatpush1.bf16.msra.mxu1 %v2726_v44  ;;  %v2742_v2 = vpack.c.bf16 %v322_v24, %v318_v30  ;;  %v2680_v1 = vpack.c.bf16 %v329_v6, %v325_v38  ;;  %v328_v36 = vld [vmem:[#allocation8 + $0x660] sm:$0xff]  ;;  %v2744_v8 = vpack.c.bf16 %v331_v34, %v327_v62  ;;  %v326_v44 = vld [vmem:[#allocation8 + $0x650] sm:$0xff]  ;;  %v333_v48 = vld [vmem:[#allocation8 + $0x688] sm:$0xff] }
 0x49b   :  { %2665 = vmatprep.subr.bf16.mxu0 %v2664_v56  ;;  %2729 = vmatprep.subr.bf16.mxu1 %v2728_v58  ;;  %v2682_v42 = vpack.c.bf16 %v328_v36, %v324_v13  ;;  %v330_v37 = vld [vmem:[#allocation8 + $0x670] sm:$0xff]  ;;  %v337_v56 = vld [vmem:[#allocation8 + $0x6a8] sm:$0xff]  ;;  %v335_v40 = vld [vmem:[#allocation8 + $0x698] sm:$0xff] }
 0x49c   :  { %v2746_v47 = vpack.c.bf16 %v330_v37, %v326_v44  ;;  %v2684_v45 = vpack.c.bf16 %v337_v56, %v333_v48  ;;  %v339_v21 = vld [vmem:[#allocation8 + $0x6b8] sm:$0xff]  ;;  %v332_v58 = vld [vmem:[#allocation8 + $0x680] sm:$0xff]  ;;  %v338_v26 = vld [vmem:[#allocation8 + $0x6b0] sm:$0xff] }
 0x49d   :  { %v2748_v55 = vpack.c.bf16 %v339_v21, %v335_v40  ;;  %v341_v31 = vld [vmem:[#allocation8 + $0x6c8] sm:$0xff]  ;;  %v343_v4 = vld [vmem:[#allocation8 + $0x6d8] sm:$0xff]  ;;  %v344_v7 = vld [vmem:[#allocation8 + $0x6e0] sm:$0xff] }
 0x49e   :  { %2667 = vmatpush1.bf16.msra.mxu0 %v2666_v54  ;;  %2731 = vmatpush1.bf16.msra.mxu1 %v2730_v23  ;;  %v336_v54 = vld [vmem:[#allocation8 + $0x6a0] sm:$0xff]  ;;  %v334_v23 = vld [vmem:[#allocation8 + $0x690] sm:$0xff]  ;;  %v347_v57 = vld [vmem:[#allocation8 + $0x6f8] sm:$0xff] }
 0x49f   :  { %2669 = vmatprep.subr.bf16.mxu0 %v2668_v46  ;;  %2733 = vmatprep.subr.bf16.mxu1 %v2732_v59  ;;  %v2686_v9 = vpack.c.bf16 %v336_v54, %v332_v58  ;;  %v2750_v14 = vpack.c.bf16 %v338_v26, %v334_v23  ;;  %v345_v46 = vld [vmem:[#allocation8 + $0x6e8] sm:$0xff]  ;;  %v340_v59 = vld [vmem:[#allocation8 + $0x6c0] sm:$0xff]  ;;  %v342_v32 = vld [vmem:[#allocation8 + $0x6d0] sm:$0xff] }
 0x4a0   :  { %v2688_v43 = vpack.c.bf16 %v345_v46, %v341_v31  ;;  %v2690_v17 = vpack.c.bf16 %v344_v7, %v340_v59  ;;  %v349_v53 = vld [vmem:[#allocation8 + $0x708] sm:$0xff]  ;;  %v351_v52 = vld [vmem:[#allocation8 + $0x718] sm:$0xff]  ;;  %v354_v22 = vld [vmem:[#allocation8 + $0x730] sm:$0xff] }
 0x4a1   :  { %v355_v63 = vld [vmem:[#allocation8 + $0x738] sm:$0xff]  ;;  %v357_v16 = vld [vmem:[#allocation8 + $0x748] sm:$0xff]  ;;  %v362_v38 = vld [vmem:[#allocation8 + $0x770] sm:$0xff] }
 0x4a2   :  { %2671 = vmatpush1.bf16.msra.mxu0 %v2670_v41  ;;  %2735 = vmatpush1.bf16.msra.mxu1 %v2734_v15  ;;  %v2752_v41 = vpack.c.bf16 %v347_v57, %v343_v4  ;;  %v346_v15 = vld [vmem:[#allocation8 + $0x6f0] sm:$0xff]  ;;  %v2756_v20 = vpack.c.bf16 %v355_v63, %v351_v52  ;;  %v359_v28 = vld [vmem:[#allocation8 + $0x758] sm:$0xff]  ;;  %v365_v62 = vld [vmem:[#allocation8 + $0x788] sm:$0xff]  ;;  %v1643_v57 = vpop.permute.xlu1 %1642 }
 0x4a3   :  { %2673 = vmatprep.subr.bf16.mxu0 %v2672_v11  ;;  %2737 = vmatprep.subr.bf16.mxu1 %v2736_v5  ;;  %v2754_v61 = vpack.c.bf16 %v346_v15, %v342_v32  ;;  %v353_v11 = vld [vmem:[#allocation8 + $0x728] sm:$0xff]  ;;  %v348_v5 = vld [vmem:[#allocation8 + $0x700] sm:$0xff]  ;;  %v363_v3 = vld [vmem:[#allocation8 + $0x778] sm:$0xff] }
 0x4a4   :  { %v2692_v12 = vpack.c.bf16 %v353_v11, %v349_v53  ;;  %v2760_v30 = vpack.c.bf16 %v363_v3, %v359_v28  ;;  %v367_v34 = vld [vmem:[#allocation8 + $0x798] sm:$0xff]  ;;  %v370_v48 = vld [vmem:[#allocation8 + $0x7b0] sm:$0xff]  ;;  %v373_v40 = vld [vmem:[#allocation8 + $0x7c8] sm:$0xff] }
 0x4a5   :  { %v371_v36 = vld [vmem:[#allocation8 + $0x7b8] sm:$0xff]  ;;  %v378_v31 = vld [vmem:[#allocation8 + $0x7f0] sm:$0xff] }
 0x4a6   :  { %2675 = vmatpush1.bf16.msra.mxu0 %v2674_v60  ;;  %2739 = vmatpush1.bf16.msra.mxu1 %v2738_v19  ;;  %v352_v60 = vld [vmem:[#allocation8 + $0x720] sm:$0xff]  ;;  %v350_v19 = vld [vmem:[#allocation8 + $0x710] sm:$0xff]  ;;  %v2764_v44 = vpack.c.bf16 %v371_v36, %v367_v34  ;;  %v375_v21 = vld [vmem:[#allocation8 + $0x7d8] sm:$0xff] }
 0x4a7   :  { %2677 = vmatprep.subr.bf16.mxu0 %v2676_v27  ;;  %2741 = vmatprep.subr.bf16.mxu1 %v2740_v33  ;;  %v2694_v0 = vpack.c.bf16 %v352_v60, %v348_v5  ;;  %v2758_v10 = vpack.c.bf16 %v354_v22, %v350_v19  ;;  %v361_v27 = vld [vmem:[#allocation8 + $0x768] sm:$0xff]  ;;  %v356_v33 = vld [vmem:[#allocation8 + $0x740] sm:$0xff]  ;;  %v379_v54 = vld [vmem:[#allocation8 + $0x7f8] sm:$0xff] }
 0x4a8   :  { %v2696_v29 = vpack.c.bf16 %v361_v27, %v357_v16  ;;  %v2768_v23 = vpack.c.bf16 %v379_v54, %v375_v21  ;;  %v381_v4 = vld [vmem:[#allocation8 + $0x800] ss:$8 sm:$0xf]  ;;  %v383_v59 = vld [vmem:[#allocation8 + $0x801] ss:$8 sm:$0xf] }
 0x4a9   :  { %v1666_v7 = vrot.slane %v381_v4, %v3419_v51  ;;  %v1845_v15 = vrot.slane %v383_v59, %v3282_v18  ;;  %v1849_v11 = vrot.slane %v383_v59, %v3413_v49  ;;  %v1857_v22 = vrot.slane %v383_v59, %v3419_v51 }
 0x4aa   :  { %2679 = vmatpush1.bf16.msra.mxu0 %v2678_v35  ;;  %2743 = vmatpush1.bf16.msra.mxu1 %v2742_v2  ;;  %v360_v35 = vld [vmem:[#allocation8 + $0x760] sm:$0xff]  ;;  %v358_v2 = vld [vmem:[#allocation8 + $0x750] sm:$0xff]  ;;  %v1662_v16 = vrot.slane %v381_v4, %v3416_v50 }
 0x4ab   :  { %2681 = vmatprep.subr.bf16.mxu0 %v2680_v1  ;;  %2745 = vmatprep.subr.bf16.mxu1 %v2744_v8  ;;  %v2698_v24 = vpack.c.bf16 %v360_v35, %v356_v33  ;;  %v2762_v6 = vpack.c.bf16 %v362_v38, %v358_v2  ;;  %v369_v1 = vld [vmem:[#allocation8 + $0x7a8] sm:$0xff]  ;;  %v364_v8 = vld [vmem:[#allocation8 + $0x780] sm:$0xff]  ;;  %v1674_v60 = vmul.f32 %v1666_v7, %v1643_v57  ;;  %v1648_v35 = vpop.permute.xlu0 %1647 }
 0x4ac   :  { %v2700_v13 = vpack.c.bf16 %v369_v1, %v365_v62  ;;  %v1853_v33 = vrot.slane %v383_v59, %v3416_v50 }
 0x4ae   :  { %2683 = vmatpush1.bf16.msra.mxu0 %v2682_v42  ;;  %2747 = vmatpush1.bf16.msra.mxu1 %v2746_v47  ;;  %v368_v42 = vld [vmem:[#allocation8 + $0x7a0] sm:$0xff]  ;;  %v366_v47 = vld [vmem:[#allocation8 + $0x790] sm:$0xff] }
 0x4af   :  { %2685 = vmatprep.subr.bf16.mxu0 %v2684_v45  ;;  %2749 = vmatprep.subr.bf16.mxu1 %v2748_v55  ;;  %v2702_v37 = vpack.c.bf16 %v368_v42, %v364_v8  ;;  %v2766_v56 = vpack.c.bf16 %v370_v48, %v366_v47  ;;  %v377_v45 = vld [vmem:[#allocation8 + $0x7e8] sm:$0xff]  ;;  %v372_v55 = vld [vmem:[#allocation8 + $0x7c0] sm:$0xff] }
 0x4b0   :  { %v2704_v58 = vpack.c.bf16 %v377_v45, %v373_v40  ;;  %v1678_v40 = vmul.f32 %v1666_v7, %v1648_v35 }
 0x4b2   :  { %2687 = vmatpush1.bf16.msra.mxu0 %v2686_v9  ;;  %2751 = vmatpush1.bf16.msra.mxu1 %v2750_v14  ;;  %v376_v9 = vld [vmem:[#allocation8 + $0x7e0] sm:$0xff]  ;;  %v374_v14 = vld [vmem:[#allocation8 + $0x7d0] sm:$0xff] }
 0x4b3   :  { %2689 = vmatprep.subr.bf16.mxu0 %v2688_v43  ;;  %2753 = vmatprep.subr.bf16.mxu1 %v2752_v41  ;;  %v2706_v26 = vpack.c.bf16 %v376_v9, %v372_v55  ;;  %v2770_v46 = vpack.c.bf16 %v378_v31, %v374_v14  ;;  %v1654_v43 = vrot.slane %v381_v4, %v3282_v18 }
 0x4b4   :  { %v1658_v41 = vrot.slane %v381_v4, %v3413_v49 }
 0x4b5   :  { %v1671_v32 = vmul.f32 %v1654_v43, %v1643_v57  ;;  %v1675_v2 = vmul.f32 %v1654_v43, %v1648_v35 }
 0x4b6   :  { %2691 = vmatpush1.bf16.msra.mxu0 %v2690_v17  ;;  %2755 = vmatpush1.bf16.msra.mxu1 %v2754_v61  ;;  %v1672_v53 = vmul.f32 %v1658_v41, %v1643_v57  ;;  %v1676_v62 = vmul.f32 %v1658_v41, %v1648_v35 }
 0x4b7   :  { %2693 = vmatprep.subr.bf16.mxu0 %v2692_v12  ;;  %2757 = vmatprep.subr.bf16.mxu1 %v2756_v20 }
 0x4ba   :  { %2695 = vmatpush1.bf16.msra.mxu0 %v2694_v0  ;;  %2759 = vmatpush1.bf16.msra.mxu1 %v2758_v10 }
 0x4bb   :  { %2697 = vmatprep.subr.bf16.mxu0 %v2696_v29  ;;  %2761 = vmatprep.subr.bf16.mxu1 %v2760_v30  ;;  %v1673_v29 = vmul.f32 %v1662_v16, %v1643_v57 }
 0x4be   :  { %2699 = vmatpush1.bf16.msra.mxu0 %v2698_v24  ;;  %2763 = vmatpush1.bf16.msra.mxu1 %v2762_v6 }
 0x4bf   :  { %2701 = vmatprep.subr.bf16.mxu0 %v2700_v13  ;;  %2765 = vmatprep.subr.bf16.mxu1 %v2764_v44 }
 0x4c2   :  { %2703 = vmatpush1.bf16.msra.mxu0 %v2702_v37  ;;  %2767 = vmatpush1.bf16.msra.mxu1 %v2766_v56 }
 0x4c3   :  { %2705 = vmatprep.subr.bf16.mxu0 %v2704_v58  ;;  %2769 = vmatprep.subr.bf16.mxu1 %v2768_v23  ;;  %v1677_v58 = vmul.f32 %v1662_v16, %v1648_v35 }
 0x4c6   :  { %2707 = vmatpush1.bf16.msra.mxu0 %v2706_v26  ;;  %2771 = vmatpush1.bf16.msra.mxu1 %v2770_v46  ;;  %v103_v26 = vld [vmem:[#allocation5] sm:$0xff] }
 0x55b   :  { %v1745_v17 = vpop.f32.mrb[2].mxu0  ;;  %v1822_v61 = vpop.f32.mrb[16].mxu1 }
 0x55c   :  { %v1833_v52 = vadd.f32 %v1745_v17, %v1671_v32  ;;  %v1747_v12 = vpop.f32.mrb[3].mxu0  ;;  %v1824_v63 = vpop.f32.mrb[17].mxu1  ;;  %v1835_v3 = vadd.f32 %v1822_v61, %v1673_v29  ;;  %v385_v29 = vld [vmem:[#allocation8 + $0x802] ss:$8 sm:$0xf] }
 0x55d   :  { %v1834_v5 = vadd.f32 %v1747_v12, %v1672_v53  ;;  %v1836_v19 = vadd.f32 %v1824_v63, %v1674_v60  ;;  %v104_v12 = vld [vmem:[#allocation5 + $0x8] sm:$0xff] }
 0x55e   :  { %v1862_v20 = vadd.f32 %v1845_v15, %v1833_v52  ;;  %v1864_v24 = vadd.f32 %v1853_v33, %v1835_v3  ;;  %v1922_v3 = vrot.slane %v385_v29, %v3282_v18 }
 0x55f   :  { %v1863_v0 = vadd.f32 %v1849_v11, %v1834_v5  ;;  %v1865_v28 = vadd.f32 %v1857_v22, %v1836_v19 }
 0x560   :  { %v2297_v10 = vmul.f32 -1.442695, %v1862_v20 }
 0x561   :  { %v2299_v27 = vmul.f32 -1.442695, %v1863_v0  ;;  %v2301_v30 = vmul.f32 -1.442695, %v1865_v28 }
 0x562   :  { %2883 = vpow2.f32 %v2297_v10 }
 0x563   :  { %2885 = vpow2.f32 %v2299_v27 }
 0x564   :  { %2887 = vpow2.f32 %v2301_v30 }
 0x565   :  { %2889 = vtanh.f32 %v1864_v24 }
 0x56b   :  { %v1751_v38 = vpop.f32.mrb[4].mxu0  ;;  %v1828_v6 = vpop.f32.mrb[18].mxu1 }
 0x56c   :  { %v2884_v1 = vpop.eup %2883  ;;  %v1837_v34 = vadd.f32 %v1751_v38, %v1675_v2  ;;  %v1753_v13 = vpop.f32.mrb[5].mxu0  ;;  %v1839_v55 = vadd.f32 %v1828_v6, %v1677_v58 }
 0x56d   :  { %v1830_v36 = vpop.f32.mrb[19].mxu1  ;;  %v2886_v8 = vpop.eup %2885  ;;  %v1876_v42 = vadd.f32 1.0, %v2884_v1  ;;  %v1838_v44 = vadd.f32 %v1753_v13, %v1676_v62  ;;  %v1934_v62 = vrot.slane %v385_v29, %v3419_v51 }
 0x56e   :  { %v1888_v37 = vadd.f32 1.0, %v2886_v8  ;;  %v1866_v47 = vadd.f32 %v1845_v15, %v1837_v34  ;;  %v1840_v21 = vadd.f32 %v1830_v36, %v1678_v40  ;;  %v2888_v54 = vpop.eup %2887  ;;  %v1868_v46 = vadd.f32 %v1853_v33, %v1839_v55 }
 0x56f   :  { %2891 = vrcp.f32 %v1876_v42  ;;  %v1867_v48 = vadd.f32 %v1849_v11, %v1838_v44  ;;  %v2890_v23 = vpop.eup %2889  ;;  %v1902_v14 = vadd.f32 1.0, %v2888_v54  ;;  %v1926_v33 = vrot.slane %v385_v29, %v3413_v49 }
 0x570   :  { %2893 = vrcp.f32 %v1888_v37  ;;  %v2298_v56 = vmul.f32 -1.442695, %v1866_v47  ;;  %v1869_v9 = vadd.f32 %v1857_v22, %v1840_v21  ;;  %v2964_v22 = vld [vmem:[#allocation2 + $0x18] sm:$0xff]  ;;  %v1930_v36 = vrot.slane %v385_v29, %v3416_v50 }
 0x571   :  { %v2300_v45 = vmul.f32 -1.442695, %v1867_v48 }
 0x572   :  { %2895 = vpow2.f32 %v2298_v56  ;;  %v2302_v57 = vmul.f32 -1.442695, %v1869_v9  ;;  %v106_v9 = vld [vmem:[#allocation5 + $0x10] sm:$0xff] }
 0x573   :  { %2897 = vpow2.f32 %v2300_v45 }
 0x574   :  { %2899 = vrcp.f32 %v1902_v14 }
 0x575   :  { %2901 = vtanh.f32 %v1868_v46 }
 0x576   :  { %2903 = vpow2.f32 %v2302_v57 }
 0x579   :  { %v2892_v31 = vpop.eup %2891 }
 0x57a   :  { %v2894_v4 = vpop.eup %2893  ;;  %v1910_v43 = vmul.f32 %v2892_v31, %v2890_v23 }
 0x57b   :  { %v1908_v59 = vmul.f32 %v2894_v4, %v103_v26 }
 0x57c   :  { %v2896_v41 = vpop.eup %2895 }
 0x57d   :  { %v1912_v7 = vadd.f32 %v1910_v43, %v1908_v59  ;;  %v1877_v32 = vadd.f32 1.0, %v2896_v41  ;;  %v2898_v15 = vpop.eup %2897 }
 0x57e   :  { %v1889_v17 = vadd.f32 1.0, %v2898_v15  ;;  %v2900_v61 = vpop.eup %2899 }
 0x57f   :  { %2905 = vtanh.f32 %v1912_v7  ;;  %2162 = vst [vmem:[#allocation12] sm:$0xff] %v1912_v7  ;;  %v2902_v53 = vpop.eup %2901 }
 0x580   :  { %2907 = vrcp.f32 %v1877_v32  ;;  %v2904_v11 = vpop.eup %2903 }
 0x581   :  { %2909 = vrcp.f32 %v1889_v17  ;;  %v1903_v0 = vadd.f32 1.0, %v2904_v11  ;;  %v107_v11 = vld [vmem:[#allocation5 + $0x18] sm:$0xff] }
 0x583   :  { %2911 = vrcp.f32 %v1903_v0 }
 0x589   :  { %v2906_v52 = vpop.eup %2905 }
 0x58a   :  { %v2908_v63 = vpop.eup %2907  ;;  %v1916_v5 = vmul.f32 %v2906_v52, %v2900_v61  ;;  %v2309_v52 = vld [vmem:[#allocation10 + $0x102] ss:$0 sm:$0xff] }
 0x58b   :  { %v2910_v60 = vpop.eup %2909  ;;  %v1911_v20 = vmul.f32 %v2908_v63, %v2902_v53 }
 0x58c   :  { %v1909_v19 = vmul.f32 %v2910_v60, %v104_v12  ;;  %2004 = vmatmul.mubr.f32.vlgmr.msra.gmra.mrb[6].mxu0 %v1916_v5  ;;  %2157 = vst [vmem:[#allocation11] sm:$0xff] %v1916_v5  ;;  %2081 = vmatmul.mubr.f32.vlgmr.msra.gmra.mrb[20].mxu1 %v1916_v5 }
 0x58d   :  { %2009 = vmatprep.mubr.f32.mxu0 %v2964_v22  ;;  %2086 = vmatprep.mubr.f32.mxu1 %v2964_v22  ;;  %v2912_v16 = vpop.eup %2911 }
 0x58e   :  { %v1913_v10 = vadd.f32 %v1911_v20, %v1909_v19 }
 0x590   :  { %2913 = vtanh.f32 %v1913_v10  ;;  %2163 = vst [vmem:[#allocation12 + $0x8] sm:$0xff] %v1913_v10 }
 0x59a   :  { %v2914_v27 = vpop.eup %2913 }
 0x59b   :  { %v1917_v28 = vmul.f32 %v2914_v27, %v2912_v16 }
 0x59d   :  { %2010 = vmatmul.mubr.f32.gmra.mrb[8].mxu0 %v1917_v28  ;;  %2158 = vst [vmem:[#allocation11 + $0x8] sm:$0xff] %v1917_v28  ;;  %2087 = vmatmul.mubr.f32.gmra.mrb[22].mxu1 %v1917_v28 }
 0x65f   :  { %v2005_v35 = vpop.f32.mrb[6].mxu0  ;;  %v2082_v30 = vpop.f32.mrb[20].mxu1 }
 0x660   :  { %v2006_v24 = vadd.f32 %v2005_v35, %v1922_v3  ;;  %v2007_v2 = vpop.f32.mrb[7].mxu0  ;;  %v2084_v38 = vpop.f32.mrb[21].mxu1  ;;  %v2083_v42 = vadd.f32 %v2082_v30, %v1930_v36 }
 0x661   :  { %v2008_v6 = vadd.f32 %v2007_v2, %v1926_v33  ;;  %v2085_v13 = vadd.f32 %v2084_v38, %v1934_v62 }
 0x662   :  { %v2303_v1 = vmul.f32 -1.442695, %v2006_v24 }
 0x663   :  { %v2305_v34 = vmul.f32 -1.442695, %v2008_v6  ;;  %v2307_v8 = vmul.f32 -1.442695, %v2085_v13 }
 0x664   :  { %2915 = vpow2.f32 %v2303_v1 }
 0x665   :  { %2917 = vpow2.f32 %v2305_v34 }
 0x666   :  { %2919 = vpow2.f32 %v2307_v8 }
 0x667   :  { %2921 = vtanh.f32 %v2083_v42 }
 0x66e   :  { %v2916_v18 = vpop.eup %2915 }
 0x66f   :  { %v2918_v49 = vpop.eup %2917  ;;  %v2099_v44 = vadd.f32 1.0, %v2916_v18 }
 0x670   :  { %v2111_v37 = vadd.f32 1.0, %v2918_v49  ;;  %v2011_v47 = vpop.f32.mrb[8].mxu0  ;;  %v2088_v48 = vpop.f32.mrb[22].mxu1 }
 0x671   :  { %2923 = vrcp.f32 %v2099_v44  ;;  %v2012_v56 = vadd.f32 %v2011_v47, %v1922_v3  ;;  %v2013_v51 = vpop.f32.mrb[9].mxu0  ;;  %v2090_v40 = vpop.f32.mrb[23].mxu1  ;;  %v2089_v14 = vadd.f32 %v2088_v48, %v1930_v36 }
 0x672   :  { %2925 = vrcp.f32 %v2111_v37  ;;  %v2014_v45 = vadd.f32 %v2013_v51, %v1926_v33  ;;  %v2920_v50 = vpop.eup %2919  ;;  %v2091_v54 = vadd.f32 %v2090_v40, %v1934_v62 }
 0x673   :  { %v2304_v21 = vmul.f32 -1.442695, %v2012_v56  ;;  %v2922_v55 = vpop.eup %2921  ;;  %v2125_v23 = vadd.f32 1.0, %v2920_v50 }
 0x674   :  { %v2306_v58 = vmul.f32 -1.442695, %v2014_v45  ;;  %v2308_v4 = vmul.f32 -1.442695, %v2091_v54 }
 0x675   :  { %2927 = vpow2.f32 %v2304_v21 }
 0x676   :  { %2929 = vpow2.f32 %v2306_v58 }
 0x677   :  { %2931 = vrcp.f32 %v2125_v23 }
 0x678   :  { %2933 = vtanh.f32 %v2089_v14 }
 0x679   :  { %2935 = vpow2.f32 %v2308_v4 }
 0x67b   :  { %v2924_v26 = vpop.eup %2923 }
 0x67c   :  { %v2926_v31 = vpop.eup %2925  ;;  %v2133_v46 = vmul.f32 %v2924_v26, %v2922_v55 }
 0x67d   :  { %v2131_v43 = vmul.f32 %v2926_v31, %v106_v9 }
 0x67f   :  { %v2928_v57 = vpop.eup %2927  ;;  %v2135_v59 = vadd.f32 %v2133_v46, %v2131_v43 }
 0x680   :  { %v2930_v41 = vpop.eup %2929  ;;  %v2100_v7 = vadd.f32 1.0, %v2928_v57 }
 0x681   :  { %v2112_v32 = vadd.f32 1.0, %v2930_v41  ;;  %2937 = vtanh.f32 %v2135_v59  ;;  %2165 = vst [vmem:[#allocation12 + $0x10] sm:$0xff] %v2135_v59  ;;  %v2932_v15 = vpop.eup %2931 }
 0x682   :  { %2939 = vrcp.f32 %v2100_v7  ;;  %v2934_v17 = vpop.eup %2933 }
 0x683   :  { %2941 = vrcp.f32 %v2112_v32  ;;  %v2936_v61 = vpop.eup %2935 }
 0x684   :  { %v2126_v20 = vadd.f32 1.0, %v2936_v61 }
 0x686   :  { %2943 = vrcp.f32 %v2126_v20 }
 0x68b   :  { %v2938_v53 = vpop.eup %2937 }
 0x68c   :  { %v2940_v12 = vpop.eup %2939  ;;  %v2139_v63 = vmul.f32 %v2938_v53, %v2932_v15 }
 0x68d   :  { %v2942_v5 = vpop.eup %2941  ;;  %v2134_v60 = vmul.f32 %v2940_v12, %v2934_v17 }
 0x68e   :  { %v2132_v0 = vmul.f32 %v2942_v5, %v107_v11  ;;  %v2145_v19 = vmul.f32 %v2309_v52, %v2139_v63  ;;  %2160 = vst [vmem:[#allocation11 + $0x10] sm:$0xff] %v2139_v63 }
 0x690   :  { %2147 = vadd.xlane.f32.xlu1 %v2145_v19  ;;  %v2136_v22 = vadd.f32 %v2134_v60, %v2132_v0  ;;  %v2944_v10 = vpop.eup %2943 }
 0x692   :  { %2945 = vtanh.f32 %v2136_v22  ;;  %2166 = vst [vmem:[#allocation12 + $0x18] sm:$0xff] %v2136_v22 }
 0x69c   :  { %v2946_v16 = vpop.eup %2945 }
 0x69d   :  { %v2140_v27 = vmul.f32 %v2946_v16, %v2944_v10 }
 0x69f   :  { %v2146_v28 = vmul.f32 %v2309_v52, %v2140_v27  ;;  %2161 = vst [vmem:[#allocation11 + $0x18] sm:$0xff] %v2140_v27 }
 0x6a1   :  { %2149 = vadd.xlane.f32.xlu0 %v2146_v28 }
 0x6a2   :  { %3086 = shalt.err (!%p3083_p2)
}
 0x6a3   :  { %s3087_s10 = scalar_lea.hbm %s3752_s6, 512 }
 0x6a4   :  { %p3088_p3 = scmp.ne.s32.totalorder %s3752_s6, %s3087_s10  ;;  %p3091_p4 = scmp.lt.u32.totalorder %s3087_s10, %s3752_s6 }
 0x6a6   :  { %p3093_p5 = pnand %p3091_p4, %p3088_p3 }
 0x6a8   :  { %3096 = shalt.err (!%p3093_p5)
}
 0x6a9   :  { %2267 = dma.vmem_to_hbm [thread:$0]  %s2262_s26, 512, %s3752_s6, [#allocation4], %s3131_s17, %s3131_s17, %s3132_s18  }
 0x6aa   :  { %s3097_s19 = scalar_lea.vmem %s3701_s29, 512  ;;  %p3102_p7 = scmp.lt.s32.totalorder %s3701_s29, %s3701_s29 }
 0x6ab   :  { %p3098_p6 = scmp.ne.s32.totalorder %s3701_s29, %s3097_s19  ;;  %p3103_p8 = scmp.lt.s32.totalorder %s3097_s19, %s3097_s19 }
 0x6ad   :  { %p3104_p9 = por %p3103_p8, %p3102_p7 }
 0x6af   :  { %p3105_p10 = pnand %p3104_p9, %p3098_p6 }
 0x6b1   :  { %3108 = shalt.err (!%p3105_p10)
}
 0x6b2   :  { %s3109_s22 = scalar_lea.hbm %s3753_s7, 512 }
 0x6b3   :  { %p3110_p11 = scmp.ne.s32.totalorder %s3753_s7, %s3109_s22  ;;  %p3113_p12 = scmp.lt.u32.totalorder %s3109_s22, %s3753_s7 }
 0x6b5   :  { %p3115_p13 = pnand %p3113_p12, %p3110_p11 }
 0x6b7   :  { %3118 = shalt.err (!%p3115_p13)
}
 0x6b8   :  { %2279 = dma.vmem_to_hbm [thread:$0]  %s3701_s29, 512, %s3753_s7, [#allocation13], %s3131_s17, %s3131_s17, %s3132_s18   ;;  %v2310_v29 = vld [vmem:[#allocation10 + $0x103] ss:$0 sm:$0xff]  ;;  %vm2248_vm8 = vcmask 7168   ;;  %vm2251_vm9 = vcmask 72704  }
 0x71d   :  { %v2148_v3 = vpop.xlane.xlu1 %2147 }
 0x71e   :  { %v2155_v33 = vadd.f32 %v2310_v29, %v2148_v3 }
 0x720   :  { %v2249_v35 = vsel %vm2248_vm8, %v2155_v33, %v3642_v39 }
 0x721   :  { %v2252_v30 = vsel %vm2251_vm9, %v2249_v35, 0.0 }
 0x722   :  { %2254 = vst [vmem:[%s3754_s8] sm:$0xff] %v2252_v30 }
 0x72e   :  { %v2150_v24 = vpop.xlane.xlu0 %2149 }
 0x72f   :  { %v2156_v2 = vadd.f32 %v2310_v29, %v2150_v24 }
 0x731   :  { %v2250_v38 = vsel %vm2248_vm8, %v2156_v2, %v3678_v25 }
 0x732   :  { %v2253_v6 = vsel %vm2251_vm9, %v2250_v38, 0.0 }
 0x733   :  { %2255 = vst [vmem:[%s3754_s8 + $0x8] sm:$0xff] %v2253_v6 }
 0x734   :  { %3125 = dma.done.wait [#allocation4], 512  }
 0x735   :  { %3126 = vsyncadd [#allocation4], 4294966784 }
 0x736   :  { %3127 = dma.done.wait [#allocation13], 512  }
 0x737   :  { %3128 = vsyncadd [#allocation13], 4294966784 }
 0x738   :  { %2290 = vsyncpa [#allocation3], 1 }
 0x739   :  { %2291 = vsyncpa [#allocation6], 1 }
 0x73a   :  { %2292 = vsyncpa [#allocation9], 1 }
 0x73b   :  { %2293 = vsyncpa [#allocation4], 1 }
 0x73c   :  { %2294 = vsyncpa [#allocation13], 1 }

</bundles_post_ra>
